<compile_context>
chip_gen: v7x
topology: tpu7x:2x2x1
jax: 0.10.0
libtpu: 0.0.40
codegen_flags: <defaults>
</compile_context>

<pallas_src>
import functools

import jax
import jax.numpy as jnp
from jax.experimental import pallas as pl
from jax.experimental.pallas import tpu as pltpu


_TILE_H_TARGET = 8   # output rows per grid step; per-generation tuning knob.


def _pick_tile_h(H, target=_TILE_H_TARGET):
    for th in range(min(H, target), 0, -1):
        if H % th == 0:
            return th
    return H


# ---------------------------------------------------------------------------
# Fused kernel: [3x3 conv + BN affine + ReLU]  ->  [3x3 conv + bias]
# for ALL heads at once (hidden weights concatenated on Cout, final weights
# block-diagonal).  One grid step = one (batch, row-tile) pair.
# ---------------------------------------------------------------------------
def _fused_head_kernel(x3_ref, w1_ref, s1_ref, b1_ref, w2_ref, b2_ref,
                       o_ref, h_ref, *, H):
    # x3_ref : (1, TH+4, W, 3*Cin)  bf16   x, dx-taps folded into channels
    # w1_ref : (3, 3*Cin, Ch)       bf16   hidden conv weights (all heads)
    # s1/b1  : (1, Ch)              f32    BN scale / shift
    # w2_ref : (9, Ch, Co)          bf16   final conv weights (block-diag)
    # b2_ref : (1, Co)              f32    final conv bias
    # o_ref  : (1, TH, W, Co)       f32
    # h_ref  : (TH+2, W+2, Ch)      bf16   VMEM scratch: hidden + 1-px halo
    _, TH, W, Co = o_ref.shape
    THp2, _, Ch = h_ref.shape
    K1 = w1_ref.shape[1]
    t = pl.program_id(1)

    # ---- stage 1: hidden rows [t*TH-1, t*TH+TH+1) for the W interior columns
    acc = jnp.zeros((THp2 * W, Ch), jnp.float32)
    for dy in range(3):                       # 3 MXU matmuls, K = 3*Cin
        patch = x3_ref[0, dy:dy + THp2, :, :].reshape(THp2 * W, K1)
        acc += jnp.dot(patch, w1_ref[dy], preferred_element_type=jnp.float32)
    acc = acc * s1_ref[...] + b1_ref[...]     # f32 BN-affine epilogue
    acc = jnp.maximum(acc, 0.0)               # ReLU
    hid = acc.reshape(THp2, W, Ch)

    # Halo rows outside the real image must be zero (2nd conv zero-pads them).
    row = jax.lax.broadcasted_iota(jnp.int32, (THp2, W, 1), 0)
    g = t * TH + row - 1
    hid = jnp.where((g >= 0) & (g < H), hid, 0.0)

    # Stash hidden (bf16) in VMEM with a zero 1-column halo on each side.
    zcol = jnp.zeros((THp2, 1, Ch), h_ref.dtype)
    h_ref[:, 0:1, :] = zcol
    h_ref[:, W + 1:W + 2, :] = zcol
    h_ref[:, 1:W + 1, :] = hid.astype(h_ref.dtype)

    # ---- stage 2: final 3x3 conv (+bias), block-diagonal over heads
    acc2 = jnp.zeros((TH * W, Co), jnp.float32)
    for dy in range(3):
        for dx in range(3):
            patch = h_ref[dy:dy + TH, dx:dx + W, :].reshape(TH * W, Ch)
            acc2 += jnp.dot(patch, w2_ref[dy * 3 + dx],
                            preferred_element_type=jnp.float32)
    acc2 = acc2 + b2_ref[...]
    o_ref[0] = acc2.reshape(TH, W, Co).astype(o_ref.dtype)


# ---------------------------------------------------------------------------
# Generic single 3x3 conv (+affine, +optional ReLU) kernel: fallback used only
# for non-standard head configs (num_conv != 2).  Same row tiling / bf16 /
# dx-fold structure, but one conv per call.
# ---------------------------------------------------------------------------
def _conv3x3_kernel(x3_ref, w_ref, s_ref, b_ref, o_ref, *, relu):
    _, TH, W, Cout = o_ref.shape
    K = w_ref.shape[1]
    acc = jnp.zeros((TH * W, Cout), jnp.float32)
    for dy in range(3):
        patch = x3_ref[0, dy:dy + TH, :, :].reshape(TH * W, K)
        acc += jnp.dot(patch, w_ref[dy], preferred_element_type=jnp.float32)
    acc = acc * s_ref[...] + b_ref[...]
    if relu:
        acc = jnp.maximum(acc, 0.0)
    o_ref[0] = acc.reshape(TH, W, Cout).astype(o_ref.dtype)


def conv3x3(x_nhwc, w_hwio, scale, shift, *, relu, out_dtype):
    N, H, W, Cin = x_nhwc.shape
    Cout = w_hwio.shape[-1]
    TH = _pick_tile_h(H)
    T = H // TH
    xp = jnp.pad(x_nhwc.astype(jnp.bfloat16), ((0, 0), (1, 1), (1, 1), (0, 0)))
    x3 = jnp.concatenate([xp[:, :, d:d + W, :] for d in range(3)], axis=-1)
    xw = jnp.stack([x3[:, t * TH:t * TH + TH + 2] for t in range(T)], axis=1)
    xw = xw.reshape(N * T, TH + 2, W, 3 * Cin)
    out = pl.pallas_call(
        functools.partial(_conv3x3_kernel, relu=relu),
        out_shape=jax.ShapeDtypeStruct((N * T, TH, W, Cout), out_dtype),
        grid=(N, T),
        in_specs=[
            pl.BlockSpec((1, TH + 2, W, 3 * Cin), lambda b, t: (b * T + t, 0, 0, 0)),
            pl.BlockSpec((3, 3 * Cin, Cout), lambda b, t: (0, 0, 0)),
            pl.BlockSpec((1, Cout), lambda b, t: (0, 0)),
            pl.BlockSpec((1, Cout), lambda b, t: (0, 0)),
        ],
        out_specs=pl.BlockSpec((1, TH, W, Cout), lambda b, t: (b * T + t, 0, 0, 0)),
        compiler_params=pltpu.CompilerParams(
            dimension_semantics=("parallel", "parallel"),
            vmem_limit_bytes=48 * 1024 * 1024),
    )(xw, w_hwio.astype(jnp.bfloat16).reshape(3, 3 * Cin, Cout),
      scale.reshape(1, Cout).astype(jnp.float32),
      shift.reshape(1, Cout).astype(jnp.float32))
    return out.reshape(N, H, W, Cout)


# ---------------------------------------------------------------------------
# SeparateHead: deterministic parameter setup + forward.
# ---------------------------------------------------------------------------
class SeparateHeadPallas:
    def __init__(self, inplanes, sep_head_dict, init_bias=-2.19,
                 use_bias=False, normalize=None, seed=0):
        if isinstance(inplanes, list):
            assert all(c == inplanes[0] for c in inplanes)
            inplanes = inplanes[0]
        assert isinstance(inplanes, int)
        self.inplanes = inplanes
        self.sep_head_dict = sep_head_dict
        self.params = {}

        key = jax.random.PRNGKey(seed)
        bn_scale = (1.0 + 1e-5) ** -0.5   # eval-mode BN: gamma=1, beta=0, mean=0, var=1
        for cur_name, cfg in sep_head_dict.items():
            out_ch, num_conv = cfg['out_channels'], cfg['num_conv']
            layers = []
            for _ in range(num_conv - 1):
                key, wk, bk = jax.random.split(key, 3)
                fan = 9 * inplanes
                w = jax.random.normal(wk, (3, 3, inplanes, inplanes),
                                      jnp.float32) * jnp.sqrt(2.0 / fan)
                conv_b = (jax.random.normal(bk, (inplanes,), jnp.float32) * 0.01
                          if use_bias else jnp.zeros((inplanes,), jnp.float32))
                scale = jnp.full((inplanes,), bn_scale, jnp.float32)
                layers.append(dict(w=w, scale=scale, shift=scale * conv_b, relu=True))
            key, wk, bk = jax.random.split(key, 3)
            w = jax.random.normal(wk, (3, 3, inplanes, out_ch),
                                  jnp.float32) * jnp.sqrt(2.0 / (9 * inplanes))
            if 'hm' in cur_name:
                b = jnp.full((out_ch,), init_bias, jnp.float32)
            else:
                b = jnp.zeros((out_ch,), jnp.float32)   # msra init: bias = 0
            layers.append(dict(w=w, scale=jnp.ones((out_ch,), jnp.float32),
                               shift=b, relu=False))
            self.params[cur_name] = layers

        # Assemble cross-head fused weights for the standard (num_conv == 2) config.
        names = list(sep_head_dict.keys())
        self._uniform2 = all(sep_head_dict[n]['num_conv'] == 2 for n in names)
        self._fused = None
        if self._uniform2:
            C = inplanes
            w1 = jnp.concatenate([self.params[n][0]['w'] for n in names], axis=-1)
            s1 = jnp.concatenate([self.params[n][0]['scale'] for n in names])
            b1 = jnp.concatenate([self.params[n][0]['shift'] for n in names])
            Ch = w1.shape[-1]
            outs = [sep_head_dict[n]['out_channels'] for n in names]
            Co = int(sum(outs))
            w2 = jnp.zeros((3, 3, Ch, Co), jnp.float32)
            b2 = jnp.zeros((Co,), jnp.float32)
            off = 0
            for i, n in enumerate(names):
                oc = outs[i]
                w2 = w2.at[:, :, i * C:(i + 1) * C, off:off + oc].set(self.params[n][1]['w'])
                b2 = b2.at[off:off + oc].set(self.params[n][1]['shift'])
                off += oc
            self._fused = dict(
                w1=w1.reshape(3, 3 * C, Ch).astype(jnp.bfloat16),
                s1=s1.reshape(1, Ch),
                b1=b1.reshape(1, Ch),
                w2=w2.reshape(9, Ch, Co).astype(jnp.bfloat16),
                b2=b2.reshape(1, Co),
                splits=list(zip(names, outs)))

        self._call = jax.jit(self._forward)

    # -- forward -----------------------------------------------------------
    def __call__(self, x_nchw):
        return self._call(x_nchw)

    def _forward(self, x_nchw):
        if self._uniform2:
            return self._fused_forward(x_nchw)
        # TODO(synk): non-standard configs (num_conv != 2) fall back to per-head,
        # per-layer Pallas convs (no cross-head / hidden+final fusion).
        return self._generic_forward(x_nchw)

    def _fused_forward(self, x_nchw):
        f = self._fused
        x = jnp.transpose(x_nchw, (0, 2, 3, 1)).astype(jnp.bfloat16)   # NCHW -> NHWC
        N, H, W, Cin = x.shape
        Ch = f['s1'].shape[-1]
        Co = f['b2'].shape[-1]
        TH = _pick_tile_h(H)
        T = H // TH

        # Pad once (H by 2 for the two stacked 3x3 convs, W by 1), fold the dx
        # taps of the first conv into channels (K = 3*Cin), and cut into
        # non-overlapping row windows with a 4-row halo.
        xp = jnp.pad(x, ((0, 0), (2, 2), (1, 1), (0, 0)))
        x3 = jnp.concatenate([xp[:, :, d:d + W, :] for d in range(3)], axis=-1)
        xw = jnp.stack([x3[:, t * TH:t * TH + TH + 4] for t in range(T)], axis=1)
        xw = xw.reshape(N * T, TH + 4, W, 3 * Cin)

        out = pl.pallas_call(
            functools.partial(_fused_head_kernel, H=H),
            out_shape=jax.ShapeDtypeStruct((N * T, TH, W, Co), jnp.float32),
            grid=(N, T),
            in_specs=[
                pl.BlockSpec((1, TH + 4, W, 3 * Cin), lambda b, t: (b * T + t, 0, 0, 0)),
                pl.BlockSpec((3, 3 * Cin, Ch), lambda b, t: (0, 0, 0)),
                pl.BlockSpec((1, Ch), lambda b, t: (0, 0)),
                pl.BlockSpec((1, Ch), lambda b, t: (0, 0)),
                pl.BlockSpec((9, Ch, Co), lambda b, t: (0, 0, 0)),
                pl.BlockSpec((1, Co), lambda b, t: (0, 0)),
            ],
            out_specs=pl.BlockSpec((1, TH, W, Co), lambda b, t: (b * T + t, 0, 0, 0)),
            scratch_shapes=[pltpu.VMEM((TH + 2, W + 2, Ch), jnp.bfloat16)],
            compiler_params=pltpu.CompilerParams(
                dimension_semantics=("parallel", "parallel"),
                vmem_limit_bytes=48 * 1024 * 1024),
        )(xw, f['w1'], f['s1'], f['b1'], f['w2'], f['b2'])

        out = out.reshape(N, H, W, Co)
        ret, off = {}, 0
        for name, oc in f['splits']:
            ret[name] = jnp.transpose(out[..., off:off + oc], (0, 3, 1, 2))
            off += oc
        return ret

    def _generic_forward(self, x_nchw):
        x = jnp.transpose(x_nchw, (0, 2, 3, 1)).astype(jnp.bfloat16)
        ret = {}
        for name, layers in self.params.items():
            h = x
            for li, layer in enumerate(layers):
                last = li == len(layers) - 1
                h = conv3x3(h, layer['w'], layer['scale'], layer['shift'],
                            relu=layer['relu'],
                            out_dtype=jnp.float32 if last else jnp.bfloat16)
            ret[name] = jnp.transpose(h, (0, 3, 1, 2))
        return ret


# ---------------------------------------------------------------------------
# Pure-JAX reference (same bf16 inputs/weights, f32 accumulation) for checking.
# ---------------------------------------------------------------------------
def _ref_forward(head, x_nchw):
    x = jnp.transpose(x_nchw, (0, 2, 3, 1)).astype(jnp.bfloat16)
    ret = {}
    for name, layers in head.params.items():
        h = x
        for layer in layers:
            y = jax.lax.conv_general_dilated(
                h, layer['w'].astype(jnp.bfloat16),
                window_strides=(1, 1), padding='SAME',
                dimension_numbers=('NHWC', 'HWIO', 'NHWC'),
                preferred_element_type=jnp.float32)
            y = y * layer['scale'] + layer['shift']
            if layer['relu']:
                h = jnp.maximum(y, 0.0).astype(jnp.bfloat16)  # kernel keeps hidden in bf16
            else:
                h = y
        ret[name] = jnp.transpose(h, (0, 3, 1, 2))
    return ret


if __name__ == "__main__":
    # Small, module-consistent shapes: N=2, C=inplanes=32, H=W=16.
    N, C, H, W = 2, 32, 16, 16
    sep_head_dict = {
        'hm':     {'out_channels': 2, 'num_conv': 2},
        'center': {'out_channels': 2, 'num_conv': 2},
        'dim':    {'out_channels': 3, 'num_conv': 2},
    }

    x = jax.random.normal(jax.random.PRNGKey(0), (N, C, H, W), jnp.float32)
    head = SeparateHeadPallas(C, sep_head_dict, init_bias=-2.19, seed=0)

    out = head(x)
    out = jax.tree_util.tree_map(jax.block_until_ready, out)

    ref = _ref_forward(head, x)
    for name in sep_head_dict:
        assert out[name].shape == (N, sep_head_dict[name]['out_channels'], H, W)
        assert jnp.allclose(out[name], ref[name], atol=1e-2, rtol=1e-2), name

    print("KERNEL_OK")
</pallas_src>

<mosaic_0001>
module attributes {stable_mosaic.version = 11 : i64} {
  func.func @_fused_head_kernel(%arg0: i32, %arg1: i32, %arg2: memref<1x12x16x96xbf16, #tpu.memory_space<vmem>>, %arg3: memref<3x96x96xbf16, #tpu.memory_space<vmem>>, %arg4: memref<1x96xf32, #tpu.memory_space<vmem>>, %arg5: memref<1x96xf32, #tpu.memory_space<vmem>>, %arg6: memref<9x96x7xbf16, #tpu.memory_space<vmem>>, %arg7: memref<1x7xf32, #tpu.memory_space<vmem>>, %arg8: memref<1x8x16x7xf32, #tpu.memory_space<vmem>>, %arg9: memref<10x18x96xbf16, #tpu.memory_space<vmem>>) attributes {dimension_semantics = [#tpu.dimension_semantics<parallel>, #tpu.dimension_semantics<parallel>], iteration_bounds = array<i64: 2, 2>, scalar_prefetch = 0 : i64, scratch_operands = 1 : i64, tpu.core_type = #tpu.core_type<tc>, window_params = [{transform_indices = @transform_0, window_bounds = array<i64: 1, 12, 16, 96>}, {pipeline_mode = #tpu.pipeline_mode<synchronous>, transform_indices = @transform_1, window_bounds = array<i64: 3, 96, 96>}, {pipeline_mode = #tpu.pipeline_mode<synchronous>, transform_indices = @transform_2, window_bounds = array<i64: 1, 96>}, {pipeline_mode = #tpu.pipeline_mode<synchronous>, transform_indices = @transform_3, window_bounds = array<i64: 1, 96>}, {pipeline_mode = #tpu.pipeline_mode<synchronous>, transform_indices = @transform_4, window_bounds = array<i64: 9, 96, 7>}, {pipeline_mode = #tpu.pipeline_mode<synchronous>, transform_indices = @transform_5, window_bounds = array<i64: 1, 7>}, {transform_indices = @transform_6, window_bounds = array<i64: 1, 8, 16, 7>}]} {
    %cst = arith.constant 0.000000e+00 : f32
    %0 = vector.broadcast %cst : f32 to vector<160x96xf32>
    %c0 = arith.constant 0 : index
    %c0_0 = arith.constant 0 : index
    %c0_1 = arith.constant 0 : index
    %c0_2 = arith.constant 0 : index
    %1 = vector.load %arg2[%c0, %c0_0, %c0_1, %c0_2] : memref<1x12x16x96xbf16, #tpu.memory_space<vmem>>, vector<1x10x16x96xbf16>
    %2 = vector.shape_cast %1 : vector<1x10x16x96xbf16> to vector<10x16x96xbf16>
    %3 = vector.shape_cast %2 : vector<10x16x96xbf16> to vector<160x96xbf16>
    %c0_3 = arith.constant 0 : index
    %c0_4 = arith.constant 0 : index
    %c0_5 = arith.constant 0 : index
    %4 = vector.load %arg3[%c0_3, %c0_4, %c0_5] : memref<3x96x96xbf16, #tpu.memory_space<vmem>>, vector<1x96x96xbf16>
    %5 = vector.shape_cast %4 : vector<1x96x96xbf16> to vector<96x96xbf16>
    %cst_6 = arith.constant dense<0.000000e+00> : vector<160x96xf32>
    %6 = tpu.matmul %3, %5, %cst_6 {dimension_numbers = #tpu.dot_dimension_numbers<[1], [0], [0], [1], [0, 0, 1, 1], [], []>} : vector<160x96xbf16>, vector<96x96xbf16>, vector<160x96xf32> -> vector<160x96xf32>
    %7 = arith.addf %0, %6 : vector<160x96xf32>
    %c0_7 = arith.constant 0 : index
    %c1 = arith.constant 1 : index
    %c0_8 = arith.constant 0 : index
    %c0_9 = arith.constant 0 : index
    %8 = vector.load %arg2[%c0_7, %c1, %c0_8, %c0_9] : memref<1x12x16x96xbf16, #tpu.memory_space<vmem>>, vector<1x10x16x96xbf16>
    %9 = vector.shape_cast %8 : vector<1x10x16x96xbf16> to vector<10x16x96xbf16>
    %10 = vector.shape_cast %9 : vector<10x16x96xbf16> to vector<160x96xbf16>
    %c1_10 = arith.constant 1 : index
    %c0_11 = arith.constant 0 : index
    %c0_12 = arith.constant 0 : index
    %11 = vector.load %arg3[%c1_10, %c0_11, %c0_12] : memref<3x96x96xbf16, #tpu.memory_space<vmem>>, vector<1x96x96xbf16>
    %12 = vector.shape_cast %11 : vector<1x96x96xbf16> to vector<96x96xbf16>
    %cst_13 = arith.constant dense<0.000000e+00> : vector<160x96xf32>
    %13 = tpu.matmul %10, %12, %cst_13 {dimension_numbers = #tpu.dot_dimension_numbers<[1], [0], [0], [1], [0, 0, 1, 1], [], []>} : vector<160x96xbf16>, vector<96x96xbf16>, vector<160x96xf32> -> vector<160x96xf32>
    %14 = arith.addf %7, %13 : vector<160x96xf32>
    %c0_14 = arith.constant 0 : index
    %c2 = arith.constant 2 : index
    %c0_15 = arith.constant 0 : index
    %c0_16 = arith.constant 0 : index
    %15 = vector.load %arg2[%c0_14, %c2, %c0_15, %c0_16] : memref<1x12x16x96xbf16, #tpu.memory_space<vmem>>, vector<1x10x16x96xbf16>
    %16 = vector.shape_cast %15 : vector<1x10x16x96xbf16> to vector<10x16x96xbf16>
    %17 = vector.shape_cast %16 : vector<10x16x96xbf16> to vector<160x96xbf16>
    %c2_17 = arith.constant 2 : index
    %c0_18 = arith.constant 0 : index
    %c0_19 = arith.constant 0 : index
    %18 = vector.load %arg3[%c2_17, %c0_18, %c0_19] : memref<3x96x96xbf16, #tpu.memory_space<vmem>>, vector<1x96x96xbf16>
    %19 = vector.shape_cast %18 : vector<1x96x96xbf16> to vector<96x96xbf16>
    %cst_20 = arith.constant dense<0.000000e+00> : vector<160x96xf32>
    %20 = tpu.matmul %17, %19, %cst_20 {dimension_numbers = #tpu.dot_dimension_numbers<[1], [0], [0], [1], [0, 0, 1, 1], [], []>} : vector<160x96xbf16>, vector<96x96xbf16>, vector<160x96xf32> -> vector<160x96xf32>
    %21 = arith.addf %14, %20 : vector<160x96xf32>
    %c0_21 = arith.constant 0 : index
    %c0_22 = arith.constant 0 : index
    %22 = vector.load %arg4[%c0_21, %c0_22] : memref<1x96xf32, #tpu.memory_space<vmem>>, vector<1x96xf32>
    %23 = vector.broadcast %22 : vector<1x96xf32> to vector<160x96xf32>
    %24 = arith.mulf %21, %23 : vector<160x96xf32>
    %c0_23 = arith.constant 0 : index
    %c0_24 = arith.constant 0 : index
    %25 = vector.load %arg5[%c0_23, %c0_24] : memref<1x96xf32, #tpu.memory_space<vmem>>, vector<1x96xf32>
    %26 = vector.broadcast %25 : vector<1x96xf32> to vector<160x96xf32>
    %27 = arith.addf %24, %26 : vector<160x96xf32>
    %cst_25 = arith.constant 0.000000e+00 : f32
    %28 = vector.broadcast %cst_25 : f32 to vector<160x96xf32>
    %29 = arith.maximumf %27, %28 : vector<160x96xf32>
    %30 = vector.shape_cast %29 : vector<160x96xf32> to vector<10x16x96xf32>
    %31 = tpu.iota {dimensions = array<i32: 0>} : vector<10x16x1xi32>
    %c8_i32 = arith.constant 8 : i32
    %32 = arith.muli %arg1, %c8_i32 : i32
    %33 = vector.broadcast %32 : i32 to vector<10x16x1xi32>
    %34 = arith.addi %33, %31 : vector<10x16x1xi32>
    %c1_i32 = arith.constant 1 : i32
    %35 = vector.broadcast %c1_i32 : i32 to vector<10x16x1xi32>
    %36 = arith.subi %34, %35 : vector<10x16x1xi32>
    %c0_i32 = arith.constant 0 : i32
    %37 = vector.broadcast %c0_i32 : i32 to vector<10x16x1xi32>
    %38 = arith.cmpi sge, %36, %37 : vector<10x16x1xi32>
    %c16_i32 = arith.constant 16 : i32
    %39 = vector.broadcast %c16_i32 : i32 to vector<10x16x1xi32>
    %40 = arith.cmpi slt, %36, %39 : vector<10x16x1xi32>
    %41 = arith.andi %38, %40 : vector<10x16x1xi1>
    %cst_26 = arith.constant 0.000000e+00 : f32
    %42 = vector.shape_cast %41 : vector<10x16x1xi1> to vector<10x16x1xi1>
    %43 = vector.broadcast %42 : vector<10x16x1xi1> to vector<10x16x96xi1>
    %44 = vector.broadcast %cst_26 : f32 to vector<10x16x96xf32>
    %45 = arith.select %43, %30, %44 : vector<10x16x96xi1>, vector<10x16x96xf32>
    %cst_27 = arith.constant 0.000000e+00 : bf16
    %46 = vector.broadcast %cst_27 : bf16 to vector<10x1x96xbf16>
    %c0_28 = arith.constant 0 : index
    %c0_29 = arith.constant 0 : index
    %c0_30 = arith.constant 0 : index
    %47 = vector.load %arg9[%c0_28, %c0_29, %c0_30] : memref<10x18x96xbf16, #tpu.memory_space<vmem>>, vector<10x1x96xbf16>
    tpu.vector_store %arg9[%c0_28, %c0_29, %c0_30], %46 {strides = array<i32>} : memref<10x18x96xbf16, #tpu.memory_space<vmem>>, vector<10x1x96xbf16>,
    %c0_31 = arith.constant 0 : index
    %c17 = arith.constant 17 : index
    %c0_32 = arith.constant 0 : index
    %48 = vector.load %arg9[%c0_31, %c17, %c0_32] : memref<10x18x96xbf16, #tpu.memory_space<vmem>>, vector<10x1x96xbf16>
    tpu.vector_store %arg9[%c0_31, %c17, %c0_32], %46 {strides = array<i32>} : memref<10x18x96xbf16, #tpu.memory_space<vmem>>, vector<10x1x96xbf16>,
    %49 = arith.truncf %45 : vector<10x16x96xf32> to vector<10x16x96xbf16>
    %c0_33 = arith.constant 0 : index
    %c1_34 = arith.constant 1 : index
    %c0_35 = arith.constant 0 : index
    %50 = vector.load %arg9[%c0_33, %c1_34, %c0_35] : memref<10x18x96xbf16, #tpu.memory_space<vmem>>, vector<10x16x96xbf16>
    tpu.vector_store %arg9[%c0_33, %c1_34, %c0_35], %49 {strides = array<i32>} : memref<10x18x96xbf16, #tpu.memory_space<vmem>>, vector<10x16x96xbf16>,
    %cst_36 = arith.constant 0.000000e+00 : f32
    %51 = vector.broadcast %cst_36 : f32 to vector<128x7xf32>
    %c0_37 = arith.constant 0 : index
    %c0_38 = arith.constant 0 : index
    %c0_39 = arith.constant 0 : index
    %52 = vector.load %arg9[%c0_37, %c0_38, %c0_39] : memref<10x18x96xbf16, #tpu.memory_space<vmem>>, vector<8x16x96xbf16>
    %53 = vector.shape_cast %52 : vector<8x16x96xbf16> to vector<128x96xbf16>
    %c0_40 = arith.constant 0 : index
    %c0_41 = arith.constant 0 : index
    %c0_42 = arith.constant 0 : index
    %54 = vector.load %arg6[%c0_40, %c0_41, %c0_42] : memref<9x96x7xbf16, #tpu.memory_space<vmem>>, vector<1x96x7xbf16>
    %55 = vector.shape_cast %54 : vector<1x96x7xbf16> to vector<96x7xbf16>
    %cst_43 = arith.constant dense<0.000000e+00> : vector<128x7xf32>
    %56 = tpu.matmul %53, %55, %cst_43 {dimension_numbers = #tpu.dot_dimension_numbers<[1], [0], [0], [1], [0, 0, 1, 1], [], []>} : vector<128x96xbf16>, vector<96x7xbf16>, vector<128x7xf32> -> vector<128x7xf32>
    %57 = arith.addf %51, %56 : vector<128x7xf32>
    %c0_44 = arith.constant 0 : index
    %c1_45 = arith.constant 1 : index
    %c0_46 = arith.constant 0 : index
    %58 = vector.load %arg9[%c0_44, %c1_45, %c0_46] : memref<10x18x96xbf16, #tpu.memory_space<vmem>>, vector<8x16x96xbf16>
    %59 = vector.shape_cast %58 : vector<8x16x96xbf16> to vector<128x96xbf16>
    %c1_47 = arith.constant 1 : index
    %c0_48 = arith.constant 0 : index
    %c0_49 = arith.constant 0 : index
    %60 = vector.load %arg6[%c1_47, %c0_48, %c0_49] : memref<9x96x7xbf16, #tpu.memory_space<vmem>>, vector<1x96x7xbf16>
    %61 = vector.shape_cast %60 : vector<1x96x7xbf16> to vector<96x7xbf16>
    %cst_50 = arith.constant dense<0.000000e+00> : vector<128x7xf32>
    %62 = tpu.matmul %59, %61, %cst_50 {dimension_numbers = #tpu.dot_dimension_numbers<[1], [0], [0], [1], [0, 0, 1, 1], [], []>} : vector<128x96xbf16>, vector<96x7xbf16>, vector<128x7xf32> -> vector<128x7xf32>
    %63 = arith.addf %57, %62 : vector<128x7xf32>
    %c0_51 = arith.constant 0 : index
    %c2_52 = arith.constant 2 : index
    %c0_53 = arith.constant 0 : index
    %64 = vector.load %arg9[%c0_51, %c2_52, %c0_53] : memref<10x18x96xbf16, #tpu.memory_space<vmem>>, vector<8x16x96xbf16>
    %65 = vector.shape_cast %64 : vector<8x16x96xbf16> to vector<128x96xbf16>
    %c2_54 = arith.constant 2 : index
    %c0_55 = arith.constant 0 : index
    %c0_56 = arith.constant 0 : index
    %66 = vector.load %arg6[%c2_54, %c0_55, %c0_56] : memref<9x96x7xbf16, #tpu.memory_space<vmem>>, vector<1x96x7xbf16>
    %67 = vector.shape_cast %66 : vector<1x96x7xbf16> to vector<96x7xbf16>
    %cst_57 = arith.constant dense<0.000000e+00> : vector<128x7xf32>
    %68 = tpu.matmul %65, %67, %cst_57 {dimension_numbers = #tpu.dot_dimension_numbers<[1], [0], [0], [1], [0, 0, 1, 1], [], []>} : vector<128x96xbf16>, vector<96x7xbf16>, vector<128x7xf32> -> vector<128x7xf32>
    %69 = arith.addf %63, %68 : vector<128x7xf32>
    %c1_58 = arith.constant 1 : index
    %c0_59 = arith.constant 0 : index
    %c0_60 = arith.constant 0 : index
    %70 = vector.load %arg9[%c1_58, %c0_59, %c0_60] : memref<10x18x96xbf16, #tpu.memory_space<vmem>>, vector<8x16x96xbf16>
    %71 = vector.shape_cast %70 : vector<8x16x96xbf16> to vector<128x96xbf16>
    %c3 = arith.constant 3 : index
    %c0_61 = arith.constant 0 : index
    %c0_62 = arith.constant 0 : index
    %72 = vector.load %arg6[%c3, %c0_61, %c0_62] : memref<9x96x7xbf16, #tpu.memory_space<vmem>>, vector<1x96x7xbf16>
    %73 = vector.shape_cast %72 : vector<1x96x7xbf16> to vector<96x7xbf16>
    %cst_63 = arith.constant dense<0.000000e+00> : vector<128x7xf32>
    %74 = tpu.matmul %71, %73, %cst_63 {dimension_numbers = #tpu.dot_dimension_numbers<[1], [0], [0], [1], [0, 0, 1, 1], [], []>} : vector<128x96xbf16>, vector<96x7xbf16>, vector<128x7xf32> -> vector<128x7xf32>
    %75 = arith.addf %69, %74 : vector<128x7xf32>
    %c1_64 = arith.constant 1 : index
    %c1_65 = arith.constant 1 : index
    %c0_66 = arith.constant 0 : index
    %76 = vector.load %arg9[%c1_64, %c1_65, %c0_66] : memref<10x18x96xbf16, #tpu.memory_space<vmem>>, vector<8x16x96xbf16>
    %77 = vector.shape_cast %76 : vector<8x16x96xbf16> to vector<128x96xbf16>
    %c4 = arith.constant 4 : index
    %c0_67 = arith.constant 0 : index
    %c0_68 = arith.constant 0 : index
    %78 = vector.load %arg6[%c4, %c0_67, %c0_68] : memref<9x96x7xbf16, #tpu.memory_space<vmem>>, vector<1x96x7xbf16>
    %79 = vector.shape_cast %78 : vector<1x96x7xbf16> to vector<96x7xbf16>
    %cst_69 = arith.constant dense<0.000000e+00> : vector<128x7xf32>
    %80 = tpu.matmul %77, %79, %cst_69 {dimension_numbers = #tpu.dot_dimension_numbers<[1], [0], [0], [1], [0, 0, 1, 1], [], []>} : vector<128x96xbf16>, vector<96x7xbf16>, vector<128x7xf32> -> vector<128x7xf32>
    %81 = arith.addf %75, %80 : vector<128x7xf32>
    %c1_70 = arith.constant 1 : index
    %c2_71 = arith.constant 2 : index
    %c0_72 = arith.constant 0 : index
    %82 = vector.load %arg9[%c1_70, %c2_71, %c0_72] : memref<10x18x96xbf16, #tpu.memory_space<vmem>>, vector<8x16x96xbf16>
    %83 = vector.shape_cast %82 : vector<8x16x96xbf16> to vector<128x96xbf16>
    %c5 = arith.constant 5 : index
    %c0_73 = arith.constant 0 : index
    %c0_74 = arith.constant 0 : index
    %84 = vector.load %arg6[%c5, %c0_73, %c0_74] : memref<9x96x7xbf16, #tpu.memory_space<vmem>>, vector<1x96x7xbf16>
    %85 = vector.shape_cast %84 : vector<1x96x7xbf16> to vector<96x7xbf16>
    %cst_75 = arith.constant dense<0.000000e+00> : vector<128x7xf32>
    %86 = tpu.matmul %83, %85, %cst_75 {dimension_numbers = #tpu.dot_dimension_numbers<[1], [0], [0], [1], [0, 0, 1, 1], [], []>} : vector<128x96xbf16>, vector<96x7xbf16>, vector<128x7xf32> -> vector<128x7xf32>
    %87 = arith.addf %81, %86 : vector<128x7xf32>
    %c2_76 = arith.constant 2 : index
    %c0_77 = arith.constant 0 : index
    %c0_78 = arith.constant 0 : index
    %88 = vector.load %arg9[%c2_76, %c0_77, %c0_78] : memref<10x18x96xbf16, #tpu.memory_space<vmem>>, vector<8x16x96xbf16>
    %89 = vector.shape_cast %88 : vector<8x16x96xbf16> to vector<128x96xbf16>
    %c6 = arith.constant 6 : index
    %c0_79 = arith.constant 0 : index
    %c0_80 = arith.constant 0 : index
    %90 = vector.load %arg6[%c6, %c0_79, %c0_80] : memref<9x96x7xbf16, #tpu.memory_space<vmem>>, vector<1x96x7xbf16>
    %91 = vector.shape_cast %90 : vector<1x96x7xbf16> to vector<96x7xbf16>
    %cst_81 = arith.constant dense<0.000000e+00> : vector<128x7xf32>
    %92 = tpu.matmul %89, %91, %cst_81 {dimension_numbers = #tpu.dot_dimension_numbers<[1], [0], [0], [1], [0, 0, 1, 1], [], []>} : vector<128x96xbf16>, vector<96x7xbf16>, vector<128x7xf32> -> vector<128x7xf32>
    %93 = arith.addf %87, %92 : vector<128x7xf32>
    %c2_82 = arith.constant 2 : index
    %c1_83 = arith.constant 1 : index
    %c0_84 = arith.constant 0 : index
    %94 = vector.load %arg9[%c2_82, %c1_83, %c0_84] : memref<10x18x96xbf16, #tpu.memory_space<vmem>>, vector<8x16x96xbf16>
    %95 = vector.shape_cast %94 : vector<8x16x96xbf16> to vector<128x96xbf16>
    %c7 = arith.constant 7 : index
    %c0_85 = arith.constant 0 : index
    %c0_86 = arith.constant 0 : index
    %96 = vector.load %arg6[%c7, %c0_85, %c0_86] : memref<9x96x7xbf16, #tpu.memory_space<vmem>>, vector<1x96x7xbf16>
    %97 = vector.shape_cast %96 : vector<1x96x7xbf16> to vector<96x7xbf16>
    %cst_87 = arith.constant dense<0.000000e+00> : vector<128x7xf32>
    %98 = tpu.matmul %95, %97, %cst_87 {dimension_numbers = #tpu.dot_dimension_numbers<[1], [0], [0], [1], [0, 0, 1, 1], [], []>} : vector<128x96xbf16>, vector<96x7xbf16>, vector<128x7xf32> -> vector<128x7xf32>
    %99 = arith.addf %93, %98 : vector<128x7xf32>
    %c2_88 = arith.constant 2 : index
    %c2_89 = arith.constant 2 : index
    %c0_90 = arith.constant 0 : index
    %100 = vector.load %arg9[%c2_88, %c2_89, %c0_90] : memref<10x18x96xbf16, #tpu.memory_space<vmem>>, vector<8x16x96xbf16>
    %101 = vector.shape_cast %100 : vector<8x16x96xbf16> to vector<128x96xbf16>
    %c8 = arith.constant 8 : index
    %c0_91 = arith.constant 0 : index
    %c0_92 = arith.constant 0 : index
    %102 = vector.load %arg6[%c8, %c0_91, %c0_92] : memref<9x96x7xbf16, #tpu.memory_space<vmem>>, vector<1x96x7xbf16>
    %103 = vector.shape_cast %102 : vector<1x96x7xbf16> to vector<96x7xbf16>
    %cst_93 = arith.constant dense<0.000000e+00> : vector<128x7xf32>
    %104 = tpu.matmul %101, %103, %cst_93 {dimension_numbers = #tpu.dot_dimension_numbers<[1], [0], [0], [1], [0, 0, 1, 1], [], []>} : vector<128x96xbf16>, vector<96x7xbf16>, vector<128x7xf32> -> vector<128x7xf32>
    %105 = arith.addf %99, %104 : vector<128x7xf32>
    %c0_94 = arith.constant 0 : index
    %c0_95 = arith.constant 0 : index
    %106 = vector.load %arg7[%c0_94, %c0_95] : memref<1x7xf32, #tpu.memory_space<vmem>>, vector<1x7xf32>
    %107 = vector.broadcast %106 : vector<1x7xf32> to vector<128x7xf32>
    %108 = arith.addf %105, %107 : vector<128x7xf32>
    %109 = vector.shape_cast %108 : vector<128x7xf32> to vector<8x16x7xf32>
    %c0_96 = arith.constant 0 : index
    %c0_97 = arith.constant 0 : index
    %c0_98 = arith.constant 0 : index
    %c0_99 = arith.constant 0 : index
    %110 = vector.load %arg8[%c0_96, %c0_97, %c0_98, %c0_99] : memref<1x8x16x7xf32, #tpu.memory_space<vmem>>, vector<1x8x16x7xf32>
    %111 = vector.shape_cast %110 : vector<1x8x16x7xf32> to vector<8x16x7xf32>
    %112 = vector.shape_cast %109 : vector<8x16x7xf32> to vector<1x8x16x7xf32>
    tpu.vector_store %arg8[%c0_96, %c0_97, %c0_98, %c0_99], %112 {strides = array<i32>} : memref<1x8x16x7xf32, #tpu.memory_space<vmem>>, vector<1x8x16x7xf32>,
    return
  }
  func.func @transform_0(%arg0: i32, %arg1: i32) -> (i32, i32, i32, i32) {
    %c2_i32 = arith.constant 2 : i32
    %0 = arith.muli %arg0, %c2_i32 : i32
    %1 = arith.addi %0, %arg1 : i32
    %c0_i32 = arith.constant 0 : i32
    %c0_i32_0 = arith.constant 0 : i32
    %c0_i32_1 = arith.constant 0 : i32
    %c0_i32_2 = arith.constant 0 : i32
    return %1, %c0_i32, %c0_i32_0, %c0_i32_1 : i32, i32, i32, i32
  }
  func.func @transform_1(%arg0: i32, %arg1: i32) -> (i32, i32, i32) {
    %c0_i32 = arith.constant 0 : i32
    %c0_i32_0 = arith.constant 0 : i32
    %c0_i32_1 = arith.constant 0 : i32
    %c0_i32_2 = arith.constant 0 : i32
    return %c0_i32, %c0_i32_0, %c0_i32_1 : i32, i32, i32
  }
  func.func @transform_2(%arg0: i32, %arg1: i32) -> (i32, i32) {
    %c0_i32 = arith.constant 0 : i32
    %c0_i32_0 = arith.constant 0 : i32
    %c0_i32_1 = arith.constant 0 : i32
    return %c0_i32, %c0_i32_0 : i32, i32
  }
  func.func @transform_3(%arg0: i32, %arg1: i32) -> (i32, i32) {
    %c0_i32 = arith.constant 0 : i32
    %c0_i32_0 = arith.constant 0 : i32
    %c0_i32_1 = arith.constant 0 : i32
    return %c0_i32, %c0_i32_0 : i32, i32
  }
  func.func @transform_4(%arg0: i32, %arg1: i32) -> (i32, i32, i32) {
    %c0_i32 = arith.constant 0 : i32
    %c0_i32_0 = arith.constant 0 : i32
    %c0_i32_1 = arith.constant 0 : i32
    %c0_i32_2 = arith.constant 0 : i32
    return %c0_i32, %c0_i32_0, %c0_i32_1 : i32, i32, i32
  }
  func.func @transform_5(%arg0: i32, %arg1: i32) -> (i32, i32) {
    %c0_i32 = arith.constant 0 : i32
    %c0_i32_0 = arith.constant 0 : i32
    %c0_i32_1 = arith.constant 0 : i32
    return %c0_i32, %c0_i32_0 : i32, i32
  }
  func.func @transform_6(%arg0: i32, %arg1: i32) -> (i32, i32, i32, i32) {
    %c2_i32 = arith.constant 2 : i32
    %0 = arith.muli %arg0, %c2_i32 : i32
    %1 = arith.addi %0, %arg1 : i32
    %c0_i32 = arith.constant 0 : i32
    %c0_i32_0 = arith.constant 0 : i32
    %c0_i32_1 = arith.constant 0 : i32
    %c0_i32_2 = arith.constant 0 : i32
    return %1, %c0_i32, %c0_i32_0, %c0_i32_1 : i32, i32, i32, i32
  }
}

</mosaic_0001>

<bundles_post_ra>
// kernel: _forward.1
= control target key start
LH: loop header
LB: loop body
LE: loop exit
PB: predicated region body
PF: predicated region fallthrough
CT: control target
= control target key end

     0   :  { %s6097_s21 = smov 0   ;;  %s6099_s22 = smov 0   ;;  %s7666_s0 = inlined_call_operand.vmem [shape: bf16[4,12,16,96], index: 0, kind: input, shape index: {}]   ;;  %s7667_s1 = inlined_call_operand.vmem [shape: bf16[3,96,96], index: 1, kind: input, shape index: {}]   ;;  %s7668_s2 = inlined_call_operand.vmem [shape: f32[1,96], index: 2, kind: input, shape index: {}]   ;;  %s7669_s3 = inlined_call_operand.vmem [shape: f32[1,96], index: 3, kind: input, shape index: {}]   ;;  %s7670_s4 = inlined_call_operand.vmem [shape: bf16[9,96,7], index: 4, kind: input, shape index: {}]   ;;  %s7671_s5 = inlined_call_operand.vmem [shape: f32[1,7], index: 5, kind: input, shape index: {}]   ;;  %s7672_s6 = inlined_call_operand.vmem [shape: f32[4,8,16,7], index: 6, kind: output, shape index: {}]  }
   0x1   :  { %s6101_s23 = smov 0   ;;  %s6103_s24 = smov 0  }
   0x2   :  { %s6105_s25 = smov 0  }
   0x3 LB: > { %s25_s26 = sadd.s32 1, %s6052_s23  ;;  %s28_s27 = sadd.s32 1, %s6056_s24  ;;  %s6060_s25 = sphi %s6105_s25, %s16_s25   ;;  %s6056_s24 = sphi %s6103_s24, %s7743_s24   ;;  %s6052_s23 = sphi %s6101_s23, %s7742_s23   ;;  %s6048_s22 = sphi %s6099_s22, %s7741_s22   ;;  %s6044_s21 = sphi %s6097_s21, %s7740_s21  }
   0x4   : > { %p26_p0 = scmp.ge.s32.totalorder %s25_s26, 2  ;;  %p4630_p1 = scmp.ge.s32.totalorder %s6060_s25, 1 }
   0x5   : > { %p236_p2 = scmp.lt.s32.totalorder %s6060_s25, 5 }
   0x6   : > { %s7745_s26 = smov (%p26_p0, %s25_s26), 0  ;;  %s7747_s27 = smov (!%p26_p0, %s28_s27), %s6056_s24 }
   0x7   : > { %p237_p3 = pnand %p4630_p1, %p236_p2  ;;  %p30_p4 = scmp.ge.s32.totalorder %s7747_s27, 2 }
   0x9   : > { %s7749_s27 = smov (%p30_p4, %s7747_s27), 0  ;;  %240 = sbr.rel (%p237_p3) target bundleno = 832 (0x340), region = 44 }
  0x10   : > { %v5895_v0 = vld [vmem:[%s7667_s1 + $0x30] sm:$0xff]   ;;  %s4631_s30 = sshll.u32 %s6048_s22, 1  ;;  %v5896_v1 = vld [vmem:[%s7667_s1 + $0x38] sm:$0xff]   ;;  %v5897_v2 = vld [vmem:[%s7667_s1 + $0x40] sm:$0xff]   ;;  %vm441_vm0 = vcmask 785408   ;;  %vm1260_vm1 = vcmask 778240  }
  0x11   : > { %s271_s9 = sadd.s32 %s6044_s21, %s4631_s30  ;;  %5326 = vmatprep.subr.bf16.mxu0 %v5895_v0  ;;  %v5898_v3 = vld [vmem:[%s7667_s1 + $0x48] sm:$0xff]   ;;  %v5899_v5 = vld [vmem:[%s7667_s1 + $0x50] sm:$0xff]   ;;  %v5900_v6 = vld [vmem:[%s7667_s1 + $0x58] sm:$0xff]   ;;  %vm1261_vm2 = vsmask.f32 256  ;;  %s4780_s30 = sshll.u32 %s6044_s21, 3 }
  0x12   : > { %p272_p5 = scmp.lt.s32.totalorder %s271_s9, 3  ;;  %5327 = vmatpush3.bf16.msra.mxu0 %v5895_v0  ;;  %v5903_v7 = vld [vmem:[%s7667_s1] sm:$0xff]   ;;  %v5905_v10 = vld [vmem:[%s7667_s1 + $0x8] sm:$0xff]   ;;  %v5907_v11 = vld [vmem:[%s7667_s1 + $0x10] sm:$0xff]   ;;  %vm1293_vm4 = vsmask.f32 7938 }
  0x13   : > { %5328 = vmatprep.subr.bf16.mxu0 %v5896_v1  ;;  %v5910_v14 = vld [vmem:[%s7667_s1 + $0x18] sm:$0xff]   ;;  %v5913_v15 = vld [vmem:[%s7667_s1 + $0x20] sm:$0xff]   ;;  %v5916_v18 = vld [vmem:[%s7667_s1 + $0x28] sm:$0xff]   ;;  %vm1587_vm12 = vcmask 781312   ;;  %vm1385_vm14 = vsmask.f32 4368 }
  0x14   : > { %s7751_s9 = smov (!%p272_p5, %s271_s9), 3  ;;  %v5919_v19 = vld [vmem:[%s7667_s1 + $0x60] sm:$0xff]   ;;  %v5921_v26 = vld [vmem:[%s7667_s1 + $0x68] sm:$0xff]   ;;  %v5923_v27 = vld [vmem:[%s7667_s1 + $0x70] sm:$0xff]  }
  0x15   : > { %s5854_s12 = smul.u32 96, %s7751_s9  ;;  %v5926_v30 = vld [vmem:[%s7667_s1 + $0x78] sm:$0xff]   ;;  %v5929_v31 = vld [vmem:[%s7667_s1 + $0x80] sm:$0xff]   ;;  %v5932_v34 = vld [vmem:[%s7667_s1 + $0x88] sm:$0xff]   ;;  %s5131_s22 = sshll.u32 %s7751_s9, 7 }
  0x16   : > { %5329 = vmatpush3.bf16.msra.mxu0 %v5896_v1  ;;  %v1266_v48 = vld [vmem:[#allocation2 + $0xc] sm:$0x1]  ;;  %vm6253_vm3 = vmand %vm1260_vm1, %vm1261_vm2  ;;  %v1263_v50 = vld [vmem:[#allocation2] sm:$0x1]  ;;  %s7593_s8 = scalar_lea.vmem %s7672_s6, %s5131_s22 }
  0x17   : > { %5330 = vmatprep.subr.bf16.mxu0 %v5897_v2  ;;  %s6148_s17 = scalar_lea.vmem %s7666_s0, %s5854_s12  ;;  %v1267_v51 = vsel %vm6253_vm3, 0, %v1266_v48  ;;  %vm6260_vm5 = vmand %vm1260_vm1, %vm1293_vm4  ;;  %v1264_v53 = vsel %vm6253_vm3, 0, %v1263_v50  ;;  %v1298_v54 = vld [vmem:[#allocation2 + $0x14] sm:$0x1]  ;;  %v1295_v56 = vld [vmem:[#allocation2 + $0x8] sm:$0x1] }
  0x18   : > { %v5901_v4 = vld [vmem:[%s6148_s17 + $0x8] sm:$0xff]   ;;  %v5902_v8 = vld [vmem:[%s6148_s17 + $0x10] sm:$0xff]   ;;  %v5904_v9 = vld [vmem:[%s6148_s17 + $0x18] sm:$0xff]   ;;  %1268 = vst [vmem:[#allocation2 + $0xc] sm:$0x1] %v1267_v51  ;;  %v1299_v55 = vsel %vm6260_vm5, 0, %v1298_v54 }
  0x19   : > { %5338 = vmatprep.mubr.msk.bf16.mxu0 %vm441_vm0, %v5901_v4  ;;  %v5906_v12 = vld [vmem:[%s6148_s17 + $0x20] sm:$0xff]   ;;  %v5908_v13 = vld [vmem:[%s6148_s17 + $0x28] sm:$0xff]   ;;  %v5909_v16 = vld [vmem:[%s6148_s17 + $0x30] sm:$0xff]   ;;  %1265 = vst [vmem:[#allocation2] sm:$0x1] %v1264_v53  ;;  %v1296_v57 = vsel %vm6260_vm5, 0, %v1295_v56 }
  0x1a   : > { %5331 = vmatpush3.bf16.msra.mxu0 %v5897_v2  ;;  %v5911_v17 = vld [vmem:[%s6148_s17 + $0x38] sm:$0xff]   ;;  %v5912_v20 = vld [vmem:[%s6148_s17 + $0x40] sm:$0xff]   ;;  %v5914_v21 = vld [vmem:[%s6148_s17 + $0x48] sm:$0xff]   ;;  %1300 = vst [vmem:[#allocation2 + $0x14] sm:$0x1] %v1299_v55 }
  0x1b   : > { %5332 = vmatprep.subr.bf16.mxu0 %v5898_v3  ;;  %v5915_v22 = vld [vmem:[%s6148_s17 + $0x50] sm:$0xff]   ;;  %v5917_v23 = vld [vmem:[%s6148_s17] sm:$0xff]   ;;  %v5918_v24 = vld [vmem:[%s6148_s17 + $0x8] sm:$0xff]   ;;  %1297 = vst [vmem:[#allocation2 + $0x8] sm:$0x1] %v1296_v57 }
  0x1c   : > { %v5920_v25 = vld [vmem:[%s6148_s17 + $0x10] sm:$0xff]   ;;  %v5922_v28 = vld [vmem:[%s6148_s17 + $0x18] sm:$0xff]   ;;  %v5924_v29 = vld [vmem:[%s6148_s17 + $0x20] sm:$0xff]  }
  0x1d   : > { %v5925_v32 = vld [vmem:[%s6148_s17 + $0x28] sm:$0xff]   ;;  %v5927_v33 = vld [vmem:[%s6148_s17 + $0x30] sm:$0xff]   ;;  %v5928_v35 = vld [vmem:[%s6148_s17 + $0x38] sm:$0xff]  }
  0x1e   : > { %5333 = vmatpush3.bf16.msra.mxu0 %v5898_v3  ;;  %v5930_v36 = vld [vmem:[%s6148_s17 + $0x40] sm:$0xff]   ;;  %v5931_v37 = vld [vmem:[%s6148_s17 + $0x48] sm:$0xff]   ;;  %v5933_v38 = vld [vmem:[%s6148_s17 + $0x10] sm:$0xff]  }
  0x1f   : > { %5334 = vmatprep.subr.bf16.mxu0 %v5899_v5  ;;  %v5934_v39 = vld [vmem:[%s6148_s17 + $0x18] sm:$0xff]   ;;  %v5935_v40 = vld [vmem:[%s6148_s17 + $0x20] sm:$0xff]   ;;  %v5936_v41 = vld [vmem:[%s6148_s17 + $0x28] sm:$0xff]  }
  0x20   : > { %v5937_v42 = vld [vmem:[%s6148_s17 + $0x30] sm:$0xff]   ;;  %v5938_v43 = vld [vmem:[%s6148_s17 + $0x38] sm:$0xff]   ;;  %v5939_v44 = vld [vmem:[%s6148_s17 + $0x40] sm:$0xff]  }
  0x21   : > { %v5940_v45 = vld [vmem:[%s6148_s17 + $0x48] sm:$0xff]   ;;  %v5941_v46 = vld [vmem:[%s6148_s17 + $0x50] sm:$0xff]   ;;  %v5942_v47 = vld [vmem:[%s6148_s17 + $0x58] sm:$0xff]  }
  0x22   : > { %5335 = vmatpush3.bf16.msra.mxu0 %v5899_v5  ;;  %v1272_v58 = vld [vmem:[#allocation2 + $0x24] sm:$0x1]  ;;  %v1269_v60 = vld [vmem:[#allocation2 + $0x18] sm:$0x1]  ;;  %v5944_v63 = vld [vmem:[%s7670_s4 + $0x30] sm:$0xff]  }
  0x23   : > { %5336 = vmatprep.subr.bf16.mxu0 %v5900_v6  ;;  %v1273_v59 = vsel %vm6253_vm3, 0, %v1272_v58  ;;  %v1270_v61 = vsel %vm6253_vm3, 0, %v1269_v60  ;;  %v5943_v62 = vld [vmem:[%s7670_s4 + $0x60] sm:$0xff]   ;;  %v5945_v0 = vld [vmem:[%s7670_s4 + $0x68] sm:$0xff]   ;;  %v5946_v5 = vld [vmem:[%s7670_s4 + $0x38] sm:$0xff]  }
  0x24   : > { %1274 = vst [vmem:[#allocation2 + $0x24] sm:$0x1] %v1273_v59  ;;  %1271 = vst [vmem:[#allocation2 + $0x18] sm:$0x1] %v1270_v61  ;;  %5478 = vmatprep.subr.bf16.mxu1 %v5943_v62  ;;  %v1304_v1 = vld [vmem:[#allocation2 + $0x2c] sm:$0x1] }
  0x25   : > { %5479 = vmatpush3.bf16.msra.mxu1 %v5943_v62  ;;  %v1305_v2 = vsel %vm6260_vm5, 0, %v1304_v1  ;;  %v1301_v3 = vld [vmem:[#allocation2 + $0x20] sm:$0x1] }
  0x26   : > { %5337 = vmatpush3.bf16.msra.mxu0 %v5900_v6  ;;  %5480 = vmatprep.subr.bf16.mxu1 %v5945_v0  ;;  %1306 = vst [vmem:[#allocation2 + $0x2c] sm:$0x1] %v1305_v2  ;;  %v1302_v4 = vsel %vm6260_vm5, 0, %v1301_v3  ;;  %v5947_v6 = vld [vmem:[%s7670_s4 + $0x70] sm:$0xff]  }
  0x27   : > { %5358 = vmatprep.subr.bf16.mxu0 %v5903_v7  ;;  %1303 = vst [vmem:[#allocation2 + $0x20] sm:$0x1] %v1302_v4 }
  0x29   : > { %5339 = vmatmul.mubr.msk.bf16.vlgmr.msra.gmra.mrb[0].mxu0 %vm441_vm0, %v5902_v8  ;;  %5481 = vmatpush3.bf16.msra.mxu1 %v5945_v0 }
  0x2a   : > { %5359 = vmatpush3.bf16.msra.mxu0 %v5903_v7  ;;  %5342 = vmatprep.mubr.msk.bf16.mxu0 %vm441_vm0, %v5904_v9  ;;  %v1278_v7 = vld [vmem:[#allocation2 + $0x3c] sm:$0x1]  ;;  %v1275_v9 = vld [vmem:[#allocation2 + $0x30] sm:$0x1] }
  0x2b   : > { %5360 = vmatprep.subr.bf16.mxu0 %v5905_v10  ;;  %5482 = vmatprep.subr.bf16.mxu1 %v5947_v6  ;;  %v1279_v8 = vsel %vm6253_vm3, 0, %v1278_v7 }
  0x2c   : > { %1280 = vst [vmem:[#allocation2 + $0x3c] sm:$0x1] %v1279_v8 }
  0x2d   : > { %5483 = vmatpush3.bf16.msra.mxu1 %v5947_v6 }
  0x2e   : > { %5361 = vmatpush3.bf16.msra.mxu0 %v5905_v10  ;;  %v1276_v10 = vsel %vm6253_vm3, 0, %v1275_v9 }
  0x2f   : > { %5362 = vmatprep.subr.bf16.mxu0 %v5907_v11  ;;  %1277 = vst [vmem:[#allocation2 + $0x30] sm:$0x1] %v1276_v10 }
  0x31   : > { %5343 = vmatmul.mubr.msk.bf16.gmra.mrb[4].mxu0 %vm441_vm0, %v5906_v12 }
  0x32   : > { %5346 = vmatprep.mubr.msk.bf16.mxu0 %vm441_vm0, %v5908_v13  ;;  %5363 = vmatpush3.bf16.msra.mxu0 %v5907_v11  ;;  %v1310_v11 = vld [vmem:[#allocation2 + $0x44] sm:$0x1]  ;;  %v1307_v13 = vld [vmem:[#allocation2 + $0x38] sm:$0x1] }
  0x33   : > { %5364 = vmatprep.subr.bf16.mxu0 %v5910_v14  ;;  %v1311_v12 = vsel %vm6260_vm5, 0, %v1310_v11 }
  0x34   : > { %1312 = vst [vmem:[#allocation2 + $0x44] sm:$0x1] %v1311_v12 }
  0x36   : > { %5365 = vmatpush3.bf16.msra.mxu0 %v5910_v14  ;;  %v5948_v14 = vld [vmem:[%s7670_s4 + $0x40] sm:$0xff]  }
  0x37   : > { %5366 = vmatprep.subr.bf16.mxu0 %v5913_v15 }
  0x39   : > { %5347 = vmatmul.mubr.msk.bf16.gmra.mrb[8].mxu0 %vm441_vm0, %v5909_v16  ;;  %v1308_v16 = vsel %vm6260_vm5, 0, %v1307_v13 }
  0x3a   : > { %5350 = vmatprep.mubr.msk.bf16.mxu0 %vm441_vm0, %v5911_v17  ;;  %5367 = vmatpush3.bf16.msra.mxu0 %v5913_v15  ;;  %v5949_v15 = vld [vmem:[%s7670_s4 + $0x78] sm:$0xff]   ;;  %1309 = vst [vmem:[#allocation2 + $0x38] sm:$0x1] %v1308_v16  ;;  %v5950_v17 = vld [vmem:[%s7670_s4 + $0x48] sm:$0xff]  }
  0x3b   : > { %5368 = vmatprep.subr.bf16.mxu0 %v5916_v18  ;;  %5484 = vmatprep.subr.bf16.mxu1 %v5949_v15 }
  0x3c   : > { %5485 = vmatpush3.bf16.msra.mxu1 %v5949_v15 }
  0x3e   : > { %5369 = vmatpush3.bf16.msra.mxu0 %v5916_v18  ;;  %v5951_v18 = vld [vmem:[%s7670_s4 + $0x80] sm:$0xff]  }
  0x3f   : > { %5390 = vmatprep.subr.bf16.mxu0 %v5919_v19  ;;  %5486 = vmatprep.subr.bf16.mxu1 %v5951_v18 }
  0x40   : > { %5487 = vmatpush3.bf16.msra.mxu1 %v5951_v18 }
  0x41   : > { %5351 = vmatmul.mubr.msk.bf16.gmra.mrb[12].mxu0 %vm441_vm0, %v5912_v20 }
  0x42   : > { %5354 = vmatprep.mubr.msk.bf16.mxu0 %vm441_vm0, %v5914_v21  ;;  %v5952_v21 = vld [vmem:[%s7670_s4 + $0x50] sm:$0xff]  }
  0x49   : > { %5355 = vmatmul.mubr.msk.bf16.gmra.mrb[16].mxu0 %vm441_vm0, %v5915_v22  ;;  %v1281_v22 = vld [vmem:[#allocation2 + $0x48] sm:$0x1] }
  0x4a   : > { %5370 = vmatprep.mubr.msk.bf16.mxu0 %vm441_vm0, %v5917_v23  ;;  %v5953_v23 = vld [vmem:[%s7670_s4 + $0x88] sm:$0xff]  }
  0x4b   : > { %5488 = vmatprep.subr.bf16.mxu1 %v5953_v23 }
  0x4c   : > { %5489 = vmatpush3.bf16.msra.mxu1 %v5953_v23 }
  0x51   : > { %5371 = vmatmul.mubr.msk.bf16.vlgmr.msra.gmra.mrb[0].mxu0 %vm441_vm0, %v5918_v24  ;;  %v1282_v24 = vsel %vm6253_vm3, 0, %v1281_v22 }
  0x52   : > { %5391 = vmatpush3.bf16.msra.mxu0 %v5919_v19  ;;  %5374 = vmatprep.mubr.msk.bf16.mxu0 %vm441_vm0, %v5920_v25  ;;  %v1284_v19 = vld [vmem:[#allocation2 + $0x54] sm:$0x1]  ;;  %v1316_v25 = vld [vmem:[#allocation2 + $0x5c] sm:$0x1]  ;;  %1283 = vst [vmem:[#allocation2 + $0x48] sm:$0x1] %v1282_v24 }
  0x53   : > { %5392 = vmatprep.subr.bf16.mxu0 %v5921_v26  ;;  %v1285_v20 = vsel %vm6253_vm3, 0, %v1284_v19 }
  0x54   : > { %1286 = vst [vmem:[#allocation2 + $0x54] sm:$0x1] %v1285_v20 }
  0x56   : > { %5393 = vmatpush3.bf16.msra.mxu0 %v5921_v26  ;;  %v1317_v26 = vsel %vm6260_vm5, 0, %v1316_v25 }
  0x57   : > { %5394 = vmatprep.subr.bf16.mxu0 %v5923_v27  ;;  %1318 = vst [vmem:[#allocation2 + $0x5c] sm:$0x1] %v1317_v26 }
  0x59   : > { %5375 = vmatmul.mubr.msk.bf16.gmra.mrb[4].mxu0 %vm441_vm0, %v5922_v28 }
  0x5a   : > { %5378 = vmatprep.mubr.msk.bf16.mxu0 %vm441_vm0, %v5924_v29  ;;  %5395 = vmatpush3.bf16.msra.mxu0 %v5923_v27  ;;  %v1313_v27 = vld [vmem:[#allocation2 + $0x50] sm:$0x1]  ;;  %v1290_v29 = vld [vmem:[#allocation2 + $0x6c] sm:$0x1] }
  0x5b   : > { %5396 = vmatprep.subr.bf16.mxu0 %v5926_v30  ;;  %v1314_v28 = vsel %vm6260_vm5, 0, %v1313_v27 }
  0x5c   : > { %1315 = vst [vmem:[#allocation2 + $0x50] sm:$0x1] %v1314_v28 }
  0x5e   : > { %5397 = vmatpush3.bf16.msra.mxu0 %v5926_v30  ;;  %v1291_v30 = vsel %vm6253_vm3, 0, %v1290_v29 }
  0x5f   : > { %5398 = vmatprep.subr.bf16.mxu0 %v5929_v31  ;;  %1292 = vst [vmem:[#allocation2 + $0x6c] sm:$0x1] %v1291_v30 }
  0x61   : > { %5379 = vmatmul.mubr.msk.bf16.gmra.mrb[8].mxu0 %vm441_vm0, %v5925_v32 }
  0x62   : > { %5382 = vmatprep.mubr.msk.bf16.mxu0 %vm441_vm0, %v5927_v33  ;;  %5399 = vmatpush3.bf16.msra.mxu0 %v5929_v31  ;;  %v1287_v31 = vld [vmem:[#allocation2 + $0x60] sm:$0x1]  ;;  %v1322_v33 = vld [vmem:[#allocation2 + $0x74] sm:$0x1] }
  0x63   : > { %5400 = vmatprep.subr.bf16.mxu0 %v5932_v34  ;;  %v1288_v32 = vsel %vm6253_vm3, 0, %v1287_v31 }
  0x64   : > { %1289 = vst [vmem:[#allocation2 + $0x60] sm:$0x1] %v1288_v32 }
  0x66   : > { %5401 = vmatpush3.bf16.msra.mxu0 %v5932_v34  ;;  %v1323_v34 = vsel %vm6260_vm5, 0, %v1322_v33 }
  0x67   : > { %5422 = vmatprep.subr.bf16.mxu0 %v5944_v63  ;;  %1324 = vst [vmem:[#allocation2 + $0x74] sm:$0x1] %v1323_v34 }
  0x69   : > { %5383 = vmatmul.mubr.msk.bf16.gmra.mrb[12].mxu0 %vm441_vm0, %v5928_v35  ;;  %v1319_v35 = vld [vmem:[#allocation2 + $0x68] sm:$0x1] }
  0x6a   : > { %5386 = vmatprep.mubr.msk.bf16.mxu0 %vm441_vm0, %v5930_v36  ;;  %v1320_v36 = vsel %vm6260_vm5, 0, %v1319_v35 }
  0x6b   : > { %1321 = vst [vmem:[#allocation2 + $0x68] sm:$0x1] %v1320_v36 }
  0x71   : > { %5387 = vmatmul.mubr.msk.bf16.gmra.mrb[16].mxu0 %vm441_vm0, %v5931_v37  ;;  %v5954_v37 = vld [vmem:[%s7670_s4 + $0x58] sm:$0xff]  }
  0x72   : > { %5402 = vmatprep.mubr.msk.bf16.mxu0 %vm441_vm0, %v5933_v38  ;;  %v6341_v38 = vld [vmem:[%s7670_s4 + $0x90] sm:$0xff]  }
  0x73   : > { %5506 = vmatprep.subr.bf16.mxu1 %v6341_v38 }
  0x79   : > { %5403 = vmatmul.mubr.msk.bf16.vlgmr.msra.gmra.mrb[0].mxu0 %vm441_vm0, %v5934_v39  ;;  %v6347_v39 = vld [vmem:[%s7670_s4] sm:$0xff]  }
  0x7a   : > { %5406 = vmatprep.mubr.msk.bf16.mxu0 %vm441_vm0, %v5935_v40  ;;  %5423 = vmatpush3.bf16.msra.mxu0 %v5944_v63  ;;  %v1172_v40 = vstv %s4780_s30 }
  0x7b   : > { %5424 = vmatprep.subr.bf16.mxu0 %v5946_v5  ;;  %vm1191_vm6 = vcmp.ge.s32.totalorder %v1172_v40, 0  ;;  %vm1201_vm7 = vcmp.lt.s32.totalorder %v1172_v40, 16  ;;  %v1176_v54 = vadd.s32 5, %v1172_v40  ;;  %v1175_v55 = vadd.s32 4, %v1172_v40 }
  0x7c   : > { %v1178_v59 = vadd.s32 7, %v1172_v40  ;;  %v1177_v60 = vadd.s32 6, %v1172_v40  ;;  %vm6373_vm13 = vmand %vm1191_vm6, %vm1201_vm7  ;;  %v1180_v0 = vadd.s32 9, %v1172_v40  ;;  %v1179_v4 = vadd.s32 8, %v1172_v40 }
  0x7d   : > { %v6389_v7 = vadd.s32 4294967295, %v1176_v54  ;;  %v6391_v8 = vadd.s32 4294967295, %v1175_v55 }
  0x7e   : > { %5425 = vmatpush3.bf16.msra.mxu0 %v5946_v5  ;;  %v6395_v11 = vadd.s32 4294967295, %v1178_v59  ;;  %v6397_v12 = vadd.s32 4294967295, %v1177_v60  ;;  %v6406_v22 = vadd.s32 4294967295, %v1179_v4 }
  0x7f   : > { %5426 = vmatprep.subr.bf16.mxu0 %v5948_v14  ;;  %vm1195_vm7 = vcmp.ge.s32.totalorder %v6389_v7, 0 }
  0x81   : > { %5407 = vmatmul.mubr.msk.bf16.gmra.mrb[4].mxu0 %vm441_vm0, %v5936_v41  ;;  %v1174_v41 = vadd.s32 3, %v1172_v40 }
  0x82   : > { %5410 = vmatprep.mubr.msk.bf16.mxu0 %vm441_vm0, %v5937_v42  ;;  %5427 = vmatpush3.bf16.msra.mxu0 %v5948_v14  ;;  %v4781_v42 = vadd.s32 4294967295, %v1172_v40 }
  0x83   : > { %5428 = vmatprep.subr.bf16.mxu0 %v5950_v17 }
  0x84   : > { %vm1190_vm8 = vcmp.ge.s32.totalorder %v4781_v42, 0  ;;  %vm1200_vm9 = vcmp.lt.s32.totalorder %v4781_v42, 16 }
  0x85   : > { %vm6381_vm15 = vmand %vm1190_vm8, %vm1200_vm9  ;;  %vm1205_vm8 = vcmp.lt.s32.totalorder %v6389_v7, 16 }
  0x86   : > { %5429 = vmatpush3.bf16.msra.mxu0 %v5950_v17  ;;  %v6401_v17 = vadd.s32 4294967295, %v1180_v0  ;;  %vm6424_vm9 = vmand %vm1587_vm12, %vm1293_vm4  ;;  %v1594_v0 = vld [vmem:[#allocation2 + $0x8] sm:$0x1] }
  0x87   : > { %5430 = vmatprep.subr.bf16.mxu0 %v5952_v21  ;;  %vm6433_vm4 = vmor %vm1261_vm2, %vm1385_vm14 }
  0x89   : > { %5411 = vmatmul.mubr.msk.bf16.gmra.mrb[8].mxu0 %vm441_vm0, %v5938_v43  ;;  %v6351_v43 = vadd.s32 4294967295, %v1174_v41  ;;  %v1597_v41 = vld [vmem:[#allocation2 + $0xc] sm:$0xf] }
  0x8a   : > { %5414 = vmatprep.mubr.msk.bf16.mxu0 %vm441_vm0, %v5939_v44  ;;  %5431 = vmatpush3.bf16.msra.mxu0 %v5952_v21  ;;  %v1173_v44 = vadd.s32 2, %v1172_v40 }
  0x8b   : > { %5432 = vmatprep.subr.bf16.mxu0 %v5954_v37  ;;  %vm1193_vm10 = vcmp.ge.s32.totalorder %v6351_v43, 0  ;;  %vm1203_vm11 = vcmp.lt.s32.totalorder %v6351_v43, 16 }
  0x8c   : > { %v6366_v51 = vadd.s32 4294967295, %v1173_v44  ;;  %vm6415_vm6 = vmand %vm1193_vm10, %vm1203_vm11  ;;  %vm1194_vm10 = vcmp.ge.s32.totalorder %v6391_v8, 0  ;;  %vm1204_vm11 = vcmp.lt.s32.totalorder %v6391_v8, 16 }
  0x8d   : > { %vm6493_vm14 = vmand %vm1194_vm10, %vm1204_vm11  ;;  %vm1198_vm10 = vcmp.ge.s32.totalorder %v6406_v22, 0  ;;  %vm1208_vm11 = vcmp.lt.s32.totalorder %v6406_v22, 16 }
  0x8e   : > { %5433 = vmatpush3.bf16.msra.mxu0 %v5954_v37  ;;  %vm1192_vm1 = vcmp.ge.s32.totalorder %v6366_v51, 0  ;;  %vm1202_vm5 = vcmp.lt.s32.totalorder %v6366_v51, 16 }
  0x8f   : > { %5450 = vmatprep.subr.bf16.mxu0 %v6347_v39  ;;  %vm6445_vm2 = vmand %vm1192_vm1, %vm1202_vm5  ;;  %vm1207_vm1 = vcmp.lt.s32.totalorder %v6395_v11, 16  ;;  %vm1196_vm5 = vcmp.ge.s32.totalorder %v6397_v12, 0 }
  0x91   : > { %5415 = vmatmul.mubr.msk.bf16.gmra.mrb[12].mxu0 %vm441_vm0, %v5940_v45  ;;  %v6356_v45 = vld [vmem:[%s7668_s2] ss:$0 sm:$0xff] }
  0x92   : > { %5418 = vmatprep.mubr.msk.bf16.mxu0 %vm441_vm0, %v5941_v46  ;;  %v6361_v46 = vld [vmem:[%s7669_s3] ss:$0 sm:$0xff] }
  0x99   : > { %5419 = vmatmul.mubr.msk.bf16.gmra.mrb[16].mxu0 %vm441_vm0, %v5942_v47 }
 0x14c   : > { %v5404_v47 = vpop.f32.mrb[0].mxu0 }
 0x14d   : > { %v1106_v48 = vmul.f32 %v5404_v47, %v6356_v45  ;;  %v998_v50 = vpop.f32.mrb[1].mxu0 }
 0x14e   : > { %v1104_v52 = vmul.f32 %v6356_v45, %v998_v50  ;;  %v5405_v53 = vpop.f32.mrb[2].mxu0 }
 0x14f   : > { %v1133_v56 = vadd.f32 %v6361_v46, %v1106_v48  ;;  %v1107_v57 = vmul.f32 %v5405_v53, %v6356_v45  ;;  %v1001_v58 = vpop.f32.mrb[3].mxu0 }
 0x150   : > { %v1131_v62 = vadd.f32 %v6361_v46, %v1104_v52  ;;  %v1105_v63 = vmul.f32 %v6356_v45, %v1001_v58  ;;  %v1589_v52 = vld [vmem:[#allocation2] sm:$0xf]  ;;  %v1601_v58 = vld [vmem:[#allocation2 + $0x14] sm:$0x1] }
 0x151   : > { %v1153_v1 = vmax.f32 %v1133_v56, 0.0  ;;  %v1134_v3 = vadd.f32 %v6361_v46, %v1107_v57  ;;  %v5956_v57 = vld [vmem:[%s7670_s4 + $0x98] sm:$0xff]  }
 0x152   : > { %v1151_v5 = vmax.f32 %v1131_v62, 0.0  ;;  %v1132_v6 = vadd.f32 %v6361_v46, %v1105_v63 }
 0x153   : > { %v1242_v9 = vsel %vm6373_vm13, %v1153_v1, 0.0  ;;  %v1154_v10 = vmax.f32 %v1134_v3, 0.0 }
 0x154   : > { %v5134_v13 = vpack.c.bf16 %v1242_v9, %v1242_v9  ;;  %v1240_v14 = vsel %vm6381_vm15, %v1151_v5, 0.0  ;;  %v1152_v15 = vmax.f32 %v1132_v6, 0.0  ;;  %v5408_v16 = vpop.f32.mrb[4].mxu0 }
 0x155   : > { %v5132_v18 = vpack.c.bf16 %v1240_v14, %v1240_v14  ;;  %v1243_v19 = vsel %vm6373_vm13, %v1154_v10, 0.0  ;;  %v1110_v20 = vmul.f32 %v5408_v16, %v6356_v45  ;;  %v1014_v21 = vpop.f32.mrb[5].mxu0  ;;  %vm6480_vm13 = vmand %vm1195_vm7, %vm1205_vm8  ;;  %vm1199_vm7 = vcmp.ge.s32.totalorder %v6401_v17, 0 }
 0x156   : > { %v1405_v23 = vshrl.u32 %v5134_v13, 16  ;;  %v1408_v24 = vshll.u32 %v5134_v13, 16  ;;  %v5135_v25 = vpack.c.bf16 %v1243_v19, %v1243_v19  ;;  %v1241_v26 = vsel %vm6381_vm15, %v1152_v15, 0.0  ;;  %v5409_v27 = vpop.f32.mrb[6].mxu0 }
 0x157   : > { %v1388_v28 = vshrl.u32 %v5132_v18, 16  ;;  %v1391_v29 = vshll.u32 %v5132_v18, 16  ;;  %v5133_v30 = vpack.c.bf16 %v1241_v26, %v1241_v26  ;;  %v1137_v31 = vadd.f32 %v6361_v46, %v1110_v20  ;;  %v1017_v32 = vpop.f32.mrb[7].mxu0 }
 0x158   : > { %v1407_v33 = vrot.slane %v1405_v23, 7  ;;  %v1413_v34 = vshrl.u32 %v5135_v25, 16  ;;  %v1416_v35 = vshll.u32 %v5135_v25, 16  ;;  %v1108_v37 = vmul.f32 %v6356_v45, %v1014_v21 }
 0x159   : > { %v1390_v42 = vrot.slane %v1388_v28, 7  ;;  %v1396_v44 = vshrl.u32 %v5133_v30, 16  ;;  %v1399_v43 = vshll.u32 %v5133_v30, 16  ;;  %v1157_v47 = vmax.f32 %v1137_v31, 0.0 }
 0x15a   : > { %v1410_v48 = vor.u32 %v1408_v24, %v1407_v33  ;;  %v1411_v50 = vrot.slane %v1407_v33, 4  ;;  %v1415_v53 = vrot.slane %v1413_v34, 7  ;;  %v1135_v54 = vadd.f32 %v6361_v46, %v1108_v37 }
 0x15b   : > { %v1393_v55 = vor.u32 %v1391_v29, %v1390_v42  ;;  %v1394_v56 = vrot.slane %v1390_v42, 4  ;;  %v1398_v59 = vrot.slane %v1396_v44, 7  ;;  %v1246_v60 = vsel %vm6415_vm6, %v1157_v47, 0.0  ;;  %v1611_v29 = vld [vmem:[#allocation2 + $0x24] sm:$0xf] }
 0x15c   : > { %v1598_v61 = vsel %vm6424_vm9, %v1410_v48, %v1597_v41  ;;  %v1418_v62 = vor.u32 %v1416_v35, %v1415_v53  ;;  %v1420_v63 = vrot.slane %v1415_v53, 4  ;;  %v5138_v1 = vpack.c.bf16 %v1246_v60, %v1246_v60  ;;  %v5412_v3 = vpop.f32.mrb[8].mxu0 }
 0x15d   : > { %1599 = vst [vmem:[#allocation2 + $0xc] sm:$0xf] %v1598_v61  ;;  %v1590_v4 = vsel %vm6424_vm9, %v1393_v55, %v1589_v52  ;;  %v1401_v5 = vor.u32 %v1399_v43, %v1398_v59  ;;  %v1403_v6 = vrot.slane %v1398_v59, 4  ;;  %v1155_v9 = vmax.f32 %v1135_v54, 0.0  ;;  %v1030_v10 = vpop.f32.mrb[9].mxu0 }
 0x15e   : > { %1591 = vst [vmem:[#allocation2] sm:$0xf] %v1590_v4  ;;  %v1419_v13 = vsel %vm6433_vm4, %v1411_v50, %v1418_v62  ;;  %v1602_v51 = vsel %vm6253_vm3, %v1420_v63, %v1601_v58  ;;  %v1439_v14 = vshrl.u32 %v5138_v1, 16  ;;  %v1442_v15 = vshll.u32 %v5138_v1, 16  ;;  %v5413_v16 = vpop.f32.mrb[10].mxu0 }
 0x15f   : > { %1600 = vst.msk [vmem:[#allocation2 + $0x10] sm:$0xf] %vm1587_vm12, %v1419_v13  ;;  %1603 = vst [vmem:[#allocation2 + $0x14] sm:$0x1] %v1602_v51  ;;  %v1402_v18 = vsel %vm6433_vm4, %v1394_v56, %v1401_v5  ;;  %v1595_v19 = vsel %vm6253_vm3, %v1403_v6, %v1594_v0  ;;  %v1244_v20 = vsel %vm6445_vm2, %v1155_v9, 0.0  ;;  %v1111_v21 = vmul.f32 %v5409_v27, %v6356_v45  ;;  %v1033_v23 = vpop.f32.mrb[11].mxu0 }
 0x160   : > { %1593 = vst.msk [vmem:[#allocation2 + $0x4] sm:$0xf] %vm1587_vm12, %v1402_v18  ;;  %1596 = vst [vmem:[#allocation2 + $0x8] sm:$0x1] %v1595_v19  ;;  %v6464_v24 = vrot.slane %v1439_v14, 7  ;;  %v5136_v25 = vpack.c.bf16 %v1244_v20, %v1244_v20  ;;  %v1109_v26 = vmul.f32 %v6356_v45, %v1017_v32  ;;  %v1114_v28 = vmul.f32 %v5412_v3, %v6356_v45 }
 0x161   : > { %v1138_v30 = vadd.f32 %v6361_v46, %v1111_v21  ;;  %v1112_v31 = vmul.f32 %v6356_v45, %v1030_v10  ;;  %v1115_v33 = vmul.f32 %v5413_v16, %v6356_v45  ;;  %v1113_v27 = vmul.f32 %v6356_v45, %v1033_v23  ;;  %v1604_v52 = vld [vmem:[#allocation2 + $0x18] sm:$0xf]  ;;  %v1615_v19 = vld [vmem:[#allocation2 + $0x2c] sm:$0x1] }
 0x162   : > { %v1444_v34 = vor.u32 %v1442_v15, %v6464_v24  ;;  %v1445_v35 = vrot.slane %v6464_v24, 4  ;;  %v1422_v37 = vshrl.u32 %v5136_v25, 16  ;;  %v1425_v41 = vshll.u32 %v5136_v25, 16  ;;  %v1608_v25 = vld [vmem:[#allocation2 + $0x20] sm:$0x1] }
 0x163   : > { %v1158_v42 = vmax.f32 %v1138_v30, 0.0  ;;  %v1136_v32 = vadd.f32 %v6361_v46, %v1109_v26  ;;  %v1141_v44 = vadd.f32 %v6361_v46, %v1114_v28  ;;  %v1139_v47 = vadd.f32 %v6361_v46, %v1112_v31 }
 0x164   : > { %v1612_v48 = vsel %vm6424_vm9, %v1444_v34, %v1611_v29  ;;  %v6487_v50 = vrot.slane %v1422_v37, 7  ;;  %v1142_v7 = vadd.f32 %v6361_v46, %v1115_v33  ;;  %v1140_v54 = vadd.f32 %v6361_v46, %v1113_v27  ;;  %v6499_v55 = vpop.f32.mrb[12].mxu0  ;;  %v1625_v34 = vld [vmem:[#allocation2 + $0x3c] sm:$0xf] }
 0x165   : > { %1613 = vst [vmem:[#allocation2 + $0x24] sm:$0xf] %v1612_v48  ;;  %v1247_v56 = vsel %vm6415_vm6, %v1158_v42, 0.0  ;;  %v1156_v58 = vmax.f32 %v1136_v32, 0.0  ;;  %v1161_v59 = vmax.f32 %v1141_v44, 0.0  ;;  %v1159_v60 = vmax.f32 %v1139_v47, 0.0 }
 0x166   : > { %v6503_v61 = vpop.f32.mrb[13].mxu0  ;;  %v1427_v8 = vor.u32 %v1425_v41, %v6487_v50  ;;  %v1428_v62 = vrot.slane %v6487_v50, 4  ;;  %v5139_v63 = vpack.c.bf16 %v1247_v56, %v1247_v56  ;;  %v1162_v0 = vmax.f32 %v1142_v7, 0.0  ;;  %v1618_v44 = vld [vmem:[#allocation2 + $0x30] sm:$0xf] }
 0x167   : > { %v6507_v1 = vpop.f32.mrb[14].mxu0  ;;  %v1245_v3 = vsel %vm6445_vm2, %v1156_v58, 0.0  ;;  %v1250_v36 = vsel %vm6480_vm13, %v1161_v59, 0.0  ;;  %v1248_v4 = vsel %vm6493_vm14, %v1159_v60, 0.0  ;;  %v1160_v5 = vmax.f32 %v1140_v54, 0.0 }
 0x168   : > { %v6515_v6 = vpop.f32.mrb[15].mxu0  ;;  %v1605_v9 = vsel %vm6424_vm9, %v1427_v8, %v1604_v52  ;;  %v1447_v10 = vshrl.u32 %v5139_v63, 16  ;;  %v1450_v13 = vshll.u32 %v5139_v63, 16  ;;  %v5137_v51 = vpack.c.bf16 %v1245_v3, %v1245_v3 }
 0x169   : > { %1606 = vst [vmem:[#allocation2 + $0x18] sm:$0xf] %v1605_v9  ;;  %v5142_v14 = vpack.c.bf16 %v1250_v36, %v1250_v36  ;;  %v5140_v15 = vpack.c.bf16 %v1248_v4, %v1248_v4  ;;  %v1251_v2 = vsel %vm6480_vm13, %v1162_v0, 0.0  ;;  %v1249_v16 = vsel %vm6493_vm14, %v1160_v5, 0.0  ;;  %v1629_v4 = vld [vmem:[#allocation2 + $0x44] sm:$0x1] }
 0x16a   : > { %vm1197_vm15 = vcmp.ge.s32.totalorder %v6395_v11, 0  ;;  %v1449_v18 = vrot.slane %v1447_v10, 7  ;;  %v1430_v20 = vshrl.u32 %v5137_v51, 16  ;;  %v1433_v21 = vshll.u32 %v5137_v51, 16 }
 0x16b   : > { %v5143_v23 = vpack.c.bf16 %v1251_v2, %v1251_v2  ;;  %v1473_v26 = vshrl.u32 %v5142_v14, 16  ;;  %v1476_v28 = vshll.u32 %v5142_v14, 16  ;;  %v1456_v29 = vshrl.u32 %v5140_v15, 16  ;;  %v1622_v14 = vld [vmem:[#allocation2 + $0x38] sm:$0x1]  ;;  %vm6565_vm2 = vmand %vm1197_vm15, %vm1207_vm1 }
 0x16c   : > { %v1459_v30 = vshll.u32 %v5140_v15, 16  ;;  %vm1206_vm6 = vcmp.lt.s32.totalorder %v6397_v12, 16  ;;  %v1452_v31 = vor.u32 %v1450_v13, %v1449_v18  ;;  %v1454_v33 = vrot.slane %v1449_v18, 4  ;;  %v5420_v41 = vpop.f32.mrb[16].mxu0 }
 0x16d   : > { %v1432_v27 = vrot.slane %v1430_v20, 7  ;;  %v1481_v37 = vshrl.u32 %v5143_v23, 16  ;;  %v1475_v42 = vrot.slane %v1473_v26, 7  ;;  %v1458_v32 = vrot.slane %v1456_v29, 7  ;;  %v1062_v48 = vpop.f32.mrb[17].mxu0  ;;  %vm6581_vm13 = vmand %vm1196_vm5, %vm1206_vm6 }
 0x16e   : > { %v1484_v43 = vshll.u32 %v5143_v23, 16  ;;  %v5141_v47 = vpack.c.bf16 %v1249_v16, %v1249_v16  ;;  %vm1209_vm8 = vcmp.lt.s32.totalorder %v6401_v17, 16  ;;  %v1453_v50 = vsel %vm6433_vm4, %v1445_v35, %v1452_v31  ;;  %v5421_v54 = vpop.f32.mrb[18].mxu0  ;;  %vm6616_vm5 = vmand %vm1198_vm10, %vm1208_vm11 }
 0x16f   : > { %v1616_v52 = vsel %vm6253_vm3, %v1454_v33, %v1615_v19  ;;  %v1435_v53 = vor.u32 %v1433_v21, %v1432_v27  ;;  %v1437_v7 = vrot.slane %v1432_v27, 4  ;;  %1614 = vst.msk [vmem:[#allocation2 + $0x28] sm:$0xf] %vm1587_vm12, %v1453_v50  ;;  %v1478_v56 = vor.u32 %v1476_v28, %v1475_v42  ;;  %v1065_v8 = vpop.f32.mrb[19].mxu0  ;;  %vm6594_vm14 = vmand %vm1199_vm7, %vm1209_vm8  ;;  %v6630_v28 = vld [vmem:[#allocation2 + $0x4] sm:$0xf] }
 0x170   : > { %1617 = vst [vmem:[#allocation2 + $0x2c] sm:$0x1] %v1616_v52  ;;  %v1479_v58 = vrot.slane %v1475_v42, 4  ;;  %v1461_v59 = vor.u32 %v1459_v30, %v1458_v32  ;;  %v1462_v60 = vrot.slane %v1458_v32, 4  ;;  %v1483_v63 = vrot.slane %v1481_v37, 7 }
 0x171   : > { %v1436_v24 = vsel %vm6433_vm4, %v1428_v62, %v1435_v53  ;;  %v1609_v35 = vsel %vm6253_vm3, %v1437_v7, %v1608_v25  ;;  %v1464_v0 = vshrl.u32 %v5141_v47, 16  ;;  %v1626_v3 = vsel %vm6424_vm9, %v1478_v56, %v1625_v34 }
 0x172   : > { %1607 = vst.msk [vmem:[#allocation2 + $0x1c] sm:$0xf] %vm1587_vm12, %v1436_v24  ;;  %1610 = vst [vmem:[#allocation2 + $0x20] sm:$0x1] %v1609_v35  ;;  %v1619_v36 = vsel %vm6424_vm9, %v1461_v59, %v1618_v44  ;;  %v1467_v5 = vshll.u32 %v5141_v47, 16  ;;  %v1118_v9 = vmul.f32 %v6499_v55, %v6356_v45  ;;  %v1486_v62 = vor.u32 %v1484_v43, %v1483_v63 }
 0x173   : > { %1627 = vst [vmem:[#allocation2 + $0x3c] sm:$0xf] %v1626_v3  ;;  %1620 = vst [vmem:[#allocation2 + $0x30] sm:$0xf] %v1619_v36  ;;  %v1488_v10 = vrot.slane %v1483_v63, 4  ;;  %v1466_v13 = vrot.slane %v1464_v0, 7  ;;  %v1116_v51 = vmul.f32 %v6356_v45, %v6503_v61  ;;  %v1119_v2 = vmul.f32 %v6507_v1, %v6356_v45 }
 0x174   : > { %v1145_v15 = vadd.f32 %v6361_v46, %v1118_v9  ;;  %v1117_v55 = vmul.f32 %v6356_v45, %v6515_v6  ;;  %v1122_v16 = vmul.f32 %v5420_v41, %v6356_v45  ;;  %v1487_v18 = vsel %vm6433_vm4, %v1479_v58, %v1486_v62 }
 0x175   : > { %v1630_v19 = vsel %vm6253_vm3, %v1488_v10, %v1629_v4  ;;  %v1469_v20 = vor.u32 %v1467_v5, %v1466_v13  ;;  %v1471_v21 = vrot.slane %v1466_v13, 4  ;;  %1628 = vst.msk [vmem:[#allocation2 + $0x40] sm:$0xf] %vm1587_vm12, %v1487_v18  ;;  %v1143_v6 = vadd.f32 %v6361_v46, %v1116_v51  ;;  %v1643_v13 = vld [vmem:[#allocation2 + $0x5c] sm:$0x1] }
 0x176   : > { %1631 = vst [vmem:[#allocation2 + $0x44] sm:$0x1] %v1630_v19  ;;  %v1165_v1 = vmax.f32 %v1145_v15, 0.0  ;;  %v1146_v23 = vadd.f32 %v6361_v46, %v1119_v2  ;;  %v1144_v25 = vadd.f32 %v6361_v46, %v1117_v55  ;;  %v1149_v29 = vadd.f32 %v6361_v46, %v1122_v16  ;;  %v6711_v49 = vld [vmem:[#allocation2 + $0x28] sm:$0xf] }
 0x177   : > { %v1470_v26 = vsel %vm6433_vm4, %v1462_v60, %v1469_v20  ;;  %v1623_v11 = vsel %vm6253_vm3, %v1471_v21, %v1622_v14  ;;  %v1120_v30 = vmul.f32 %v6356_v45, %v1062_v48  ;;  %v1163_v33 = vmax.f32 %v1143_v6, 0.0  ;;  %v1639_v60 = vld [vmem:[#allocation2 + $0x54] sm:$0xf]  ;;  %v1636_v14 = vld [vmem:[#allocation2 + $0x50] sm:$0x1] }
 0x178   : > { %1621 = vst.msk [vmem:[#allocation2 + $0x34] sm:$0xf] %vm1587_vm12, %v1470_v26  ;;  %1624 = vst [vmem:[#allocation2 + $0x38] sm:$0x1] %v1623_v11  ;;  %v1254_v31 = vsel %vm6565_vm2, %v1165_v1, 0.0  ;;  %v1166_v27 = vmax.f32 %v1146_v23, 0.0  ;;  %v1123_v32 = vmul.f32 %v5421_v54, %v6356_v45  ;;  %v6607_v48 = vmul.f32 %v6356_v45, %v1065_v8 }
 0x179   : > { %v1164_v34 = vmax.f32 %v1144_v25, 0.0  ;;  %v5146_v37 = vpack.c.bf16 %v1254_v31, %v1254_v31  ;;  %v1169_v41 = vmax.f32 %v1149_v29, 0.0  ;;  %v1147_v42 = vadd.f32 %v6361_v46, %v1120_v30  ;;  %v1632_v8 = vld [vmem:[#allocation2 + $0x48] sm:$0xf]  ;;  %v1653_v20 = vld [vmem:[#allocation2 + $0x6c] sm:$0xf] }
 0x17a   : > { %v1252_v44 = vsel %vm6581_vm13, %v1163_v33, 0.0  ;;  %v1255_v43 = vsel %vm6565_vm2, %v1166_v27, 0.0  ;;  %vm2306_vm15 = vcmask 1042432   ;;  %vm2307_vm1 = vcmask 1046532   ;;  %v1688_v27 = vld [vmem:[#allocation2 + $0x8] sm:$0x1] }
 0x17b   : > { %v1253_v47 = vsel %vm6581_vm13, %v1164_v34, 0.0  ;;  %v1507_v17 = vshrl.u32 %v5146_v37, 16  ;;  %v1510_v50 = vshll.u32 %v5146_v37, 16  ;;  %v5144_v52 = vpack.c.bf16 %v1252_v44, %v1252_v44  ;;  %v2282_v34 = vld [vmem:[#allocation2] sm:$0xe]  ;;  %vm6651_vm6 = vmor %vm2306_vm15, %vm2307_vm1 }
 0x17c   : > { %v5147_v53 = vpack.c.bf16 %v1255_v43, %v1255_v43  ;;  %v5145_v7 = vpack.c.bf16 %v1253_v47, %v1253_v47  ;;  %v1258_v54 = vsel %vm6594_vm14, %v1169_v41, 0.0  ;;  %v1167_v56 = vmax.f32 %v1147_v42, 0.0  ;;  %v1646_v43 = vld [vmem:[#allocation2 + $0x60] sm:$0xf] }
 0x17d   : > { %v1150_v58 = vadd.f32 %v6361_v46, %v1123_v32  ;;  %v1509_v59 = vrot.slane %v1507_v17, 7  ;;  %v1490_v24 = vshrl.u32 %v5144_v52, 16  ;;  %v1493_v35 = vshll.u32 %v5144_v52, 16 }
 0x17e   : > { %v1515_v63 = vshrl.u32 %v5147_v53, 16  ;;  %v1518_v0 = vshll.u32 %v5147_v53, 16  ;;  %v1498_v3 = vshrl.u32 %v5145_v7, 16  ;;  %v1501_v36 = vshll.u32 %v5145_v7, 16 }
 0x17f   : > { %v5150_v4 = vpack.c.bf16 %v1258_v54, %v1258_v54  ;;  %v1512_v5 = vor.u32 %v1510_v50, %v1509_v59  ;;  %v1513_v9 = vrot.slane %v1509_v59, 4  ;;  %v1492_v62 = vrot.slane %v1490_v24, 7 }
 0x180   : > { %v1517_v10 = vrot.slane %v1515_v63, 7  ;;  %v1500_v51 = vrot.slane %v1498_v3, 7  ;;  %v1256_v22 = vsel %vm6616_vm5, %v1167_v56, 0.0  ;;  %v1170_v11 = vmax.f32 %v1150_v58, 0.0  ;;  %v6658_v56 = vld [vmem:[#allocation2 + $0x10] sm:$0xf] }
 0x181   : > { %v1541_v15 = vshrl.u32 %v5150_v4, 16  ;;  %v1544_v2 = vshll.u32 %v5150_v4, 16  ;;  %v1640_v55 = vsel %vm6424_vm9, %v1512_v5, %v1639_v60  ;;  %v1495_v16 = vor.u32 %v1493_v35, %v1492_v62  ;;  %v1689_v60 = vld [vmem:[#allocation2 + $0x14] sm:$0x1] }
 0x182   : > { %v1496_v18 = vrot.slane %v1492_v62, 4  ;;  %v1520_v19 = vor.u32 %v1518_v0, %v1517_v10  ;;  %1641 = vst [vmem:[#allocation2 + $0x54] sm:$0xf] %v1640_v55  ;;  %v1522_v21 = vrot.slane %v1517_v10, 4  ;;  %v1503_v61 = vor.u32 %v1501_v36, %v1500_v51 }
 0x183   : > { %v1505_v1 = vrot.slane %v1500_v51, 4  ;;  %v6624_v6 = vrot.slane %v1541_v15, 7  ;;  %v1633_v23 = vsel %vm6424_vm9, %v1495_v16, %v1632_v8  ;;  %v5148_v26 = vpack.c.bf16 %v1256_v22, %v1256_v22  ;;  %v2283_v51 = vld [vmem:[#allocation2 + $0xc] sm:$0xe]  ;;  %v6676_v22 = vld [vmem:[#allocation2] sm:$0xf] }
 0x184   : > { %v1521_v25 = vsel %vm6433_vm4, %v1513_v9, %v1520_v19  ;;  %1634 = vst [vmem:[#allocation2 + $0x48] sm:$0xf] %v1633_v23  ;;  %v1644_v29 = vsel %vm6253_vm3, %v1522_v21, %v1643_v13  ;;  %v1504_v30 = vsel %vm6433_vm4, %v1496_v18, %v1503_v61  ;;  %v1259_v32 = vsel %vm6594_vm14, %v1170_v11, 0.0  ;;  %v1657_v9 = vld [vmem:[#allocation2 + $0x74] sm:$0x1] }
 0x185   : > { %1642 = vst.msk [vmem:[#allocation2 + $0x58] sm:$0xf] %vm1587_vm12, %v1521_v25  ;;  %v1637_v31 = vsel %vm6253_vm3, %v1505_v1, %v1636_v14  ;;  %v1546_v33 = vor.u32 %v1544_v2, %v6624_v6  ;;  %1645 = vst [vmem:[#allocation2 + $0x5c] sm:$0x1] %v1644_v29  ;;  %v1547_v37 = vrot.slane %v6624_v6, 4  ;;  %v1524_v41 = vshrl.u32 %v5148_v26, 16 }
 0x186   : > { %1635 = vst.msk [vmem:[#allocation2 + $0x4c] sm:$0xf] %vm1587_vm12, %v1504_v30  ;;  %1638 = vst [vmem:[#allocation2 + $0x50] sm:$0x1] %v1637_v31  ;;  %v1527_v42 = vshll.u32 %v5148_v26, 16  ;;  %v5151_v47 = vpack.c.bf16 %v1259_v32, %v1259_v32  ;;  %v1148_v17 = vadd.f32 %v6361_v46, %v6607_v48  ;;  %v1713_v50 = vshrl.u32 %v6630_v28, 16 }
 0x187   : > { %v1654_v44 = vsel %vm6424_vm9, %v1546_v33, %v1653_v20  ;;  %v6655_v53 = vrot.slane %v1524_v41, 7  ;;  %v1719_v12 = vshll.u32 %v1688_v27, 16  ;;  %v4866_v7 = vrot.slane %v2282_v34, 9  ;;  %v6678_v19 = vld [vmem:[#allocation2 + $0xc] sm:$0xf] }
 0x188   : > { %1655 = vst [vmem:[#allocation2 + $0x6c] sm:$0xf] %v1654_v44  ;;  %v2311_v54 = vrot.slane %v6630_v28, 5  ;;  %v1549_v58 = vshrl.u32 %v5151_v47, 16  ;;  %v1552_v59 = vshll.u32 %v5151_v47, 16  ;;  %v1168_v46 = vmax.f32 %v1148_v17, 0.0 }
 0x189   : > { %v2314_v48 = vrot.slane %v1688_v27, 5  ;;  %v1529_v24 = vor.u32 %v1527_v42, %v6655_v53  ;;  %v1530_v35 = vrot.slane %v6655_v53, 4  ;;  %v6662_v63 = vrot.slane %v1719_v12, 5  ;;  %v1650_v61 = vld [vmem:[#allocation2 + $0x68] sm:$0x1] }
 0x18a   : > { %v2312_v8 = vsel %vm6651_vm6, %v4866_v7, %v2311_v54  ;;  %v1551_v0 = vrot.slane %v1549_v58, 7  ;;  %v1257_v3 = vsel %vm6616_vm5, %v1168_v46, 0.0  ;;  %v2313_v36 = vrot.slane %v2311_v54, 4  ;;  %v6695_v42 = vld [vmem:[#allocation2 + $0x1c] sm:$0xf] }
 0x18b   : > { %v1733_v4 = vshll.u32 %v6658_v56, 16  ;;  %vm1696_vm7 = vsmask.f32 3328  ;;  %vm1697_vm8 = vsmask.f32 7440  ;;  %v1647_v5 = vsel %vm6424_vm9, %v1529_v24, %v1646_v43 }
 0x18c   : > { %v5149_v62 = vpack.c.bf16 %v1257_v3, %v1257_v3  ;;  %v1737_v10 = vshrl.u32 %v6658_v56, 16  ;;  %v1743_v13 = vshll.u32 %v1689_v60, 16  ;;  %1648 = vst [vmem:[#allocation2 + $0x60] sm:$0xf] %v1647_v5  ;;  %v1554_v14 = vor.u32 %v1552_v59, %v1551_v0  ;;  %v2284_v32 = vld [vmem:[#allocation2 + $0x18] sm:$0xe] }
 0x18d   : > { %v1556_v15 = vrot.slane %v1551_v0, 4  ;;  %v2315_v45 = vsel %vm6651_vm6, %v2313_v36, %v2314_v48  ;;  %v6674_v2 = vrot.slane %v1733_v4, 5  ;;  %v4867_v6 = vrot.slane %v2283_v51, 9  ;;  %v6697_v53 = vld [vmem:[#allocation2 + $0x20] sm:$0x1] }
 0x18e   : > { %v1532_v55 = vshrl.u32 %v5149_v62, 16  ;;  %v1535_v16 = vshll.u32 %v5149_v62, 16  ;;  %v4886_v40 = vcombine.low %v2312_v8, %v2315_v45  ;;  %v1739_v18 = vrot.slane %v1737_v10, 4  ;;  %v2285_v58 = vld [vmem:[#allocation2 + $0x24] sm:$0xe] }
 0x18f   : > { %v1555_v20 = vsel %vm6433_vm4, %v1547_v37, %v1554_v14  ;;  %v1658_v21 = vsel %vm6253_vm3, %v1556_v15, %v1657_v9  ;;  %v6684_v1 = vrot.slane %v1743_v13, 5  ;;  %v2318_v25 = vrot.slane %v6658_v56, 5  ;;  %v6721_v36 = vld [vmem:[#allocation2 + $0x2c] sm:$0x1]  ;;  %v6728_v15 = vld [vmem:[#allocation2 + $0x18] sm:$0xf] }
 0x190   : > { %1656 = vst.msk [vmem:[#allocation2 + $0x70] sm:$0xf] %vm1587_vm12, %v1555_v20  ;;  %1659 = vst [vmem:[#allocation2 + $0x74] sm:$0x1] %v1658_v21  ;;  %v1534_v23 = vrot.slane %v1532_v55, 7  ;;  %5490 = vmatprep.mubr.msk.bf16.mxu1 %vm441_vm0, %v4886_v40  ;;  %v2321_v26 = vrot.slane %v1689_v60, 5  ;;  %v1740_v60 = vor.u32 %v1739_v18, %v6674_v2 }
 0x191   : > { %v1700_v11 = vshrl.u32 %v6676_v22, 16  ;;  %v1703_v29 = vshll.u32 %v6676_v22, 16  ;;  %v1709_v30 = vshll.u32 %v6630_v28, 16  ;;  %v1715_v31 = vrot.slane %v1713_v50, 4  ;;  %v5957_v40 = vld [vmem:[%s7670_s4 + $0xa0] sm:$0xff]  }
 0x192   : > { %v1724_v33 = vshrl.u32 %v6678_v19, 16  ;;  %v1537_v27 = vor.u32 %v1535_v16, %v1534_v23  ;;  %v1539_v34 = vrot.slane %v1534_v23, 4  ;;  %v2319_v37 = vsel %vm6651_vm6, %v4867_v6, %v2318_v25 }
 0x193   : > { %v2320_v41 = vrot.slane %v2318_v25, 4  ;;  %v1702_v44 = vrot.slane %v1700_v11, 4  ;;  %v1705_v43 = vrot.slane %v1703_v29, 5  ;;  %v1711_v47 = vrot.slane %v1709_v30, 5  ;;  %v6748_v25 = vld [vmem:[#allocation2 + $0x24] sm:$0xf] }
 0x194   : > { %v1726_v17 = vrot.slane %v1724_v33, 4  ;;  %v1538_v50 = vsel %vm6433_vm4, %v1530_v35, %v1537_v27  ;;  %v1651_v12 = vsel %vm6253_vm3, %v1539_v34, %v1650_v61  ;;  %v1727_v54 = vshll.u32 %v6678_v19, 16  ;;  %vm6715_vm3 = vmor %vm1696_vm7, %vm1697_vm8 }
 0x195   : > { %v2322_v7 = vsel %vm6651_vm6, %v2320_v41, %v2321_v26  ;;  %1649 = vst.msk [vmem:[#allocation2 + $0x64] sm:$0xf] %vm1587_vm12, %v1538_v50  ;;  %1652 = vst [vmem:[#allocation2 + $0x68] sm:$0x1] %v1651_v12  ;;  %v1706_v46 = vor.u32 %v1705_v43, %v1702_v44  ;;  %v1716_v48 = vor.u32 %v1715_v31, %v1711_v47  ;;  %v4868_v8 = vrot.slane %v2284_v32, 9 }
 0x196   : > { %v4887_v59 = vcombine.low %v2319_v37, %v2322_v7  ;;  %v1729_v35 = vrot.slane %v1727_v54, 5  ;;  %v2325_v0 = vrot.slane %v6695_v42, 5  ;;  %v2328_v3 = vrot.slane %v6697_v53, 5  ;;  %v2286_v37 = vld [vmem:[#allocation2 + $0x30] sm:$0xe] }
 0x197   : > { %v1707_v4 = vrot.slane %v1706_v46, 4  ;;  %v1717_v5 = vrot.slane %v1716_v48, 4  ;;  %v1741_v9 = vrot.slane %v1740_v60, 4  ;;  %v4869_v62 = vrot.slane %v2285_v58, 9  ;;  %v6770_v54 = vld [vmem:[#allocation2 + $0x34] sm:$0xf] }
 0x198   : > { %5491 = vmatmul.mubr.msk.bf16.vlgmr.msra.gmra.mrb[0].mxu1 %vm441_vm0, %v4887_v59  ;;  %v1730_v10 = vor.u32 %v1729_v35, %v1726_v17  ;;  %v2326_v13 = vsel %vm6651_vm6, %v4868_v8, %v2325_v0  ;;  %v2327_v51 = vrot.slane %v2325_v0, 4  ;;  %v2332_v14 = vrot.slane %v6711_v49, 5  ;;  %v5960_v17 = vld [vmem:[%s7670_s4 + $0xa8] sm:$0xff]   ;;  %v5961_v58 = vld [vmem:[%s7670_s4 + $0x10] sm:$0xff]   ;;  %v6779_v60 = vld [vmem:[#allocation2 + $0x38] sm:$0x1] }
 0x199   : > { %5507 = vmatpush3.bf16.msra.mxu1 %v6341_v38  ;;  %v1712_v45 = vsel %vm6715_vm3, %v1707_v4, %v1711_v47  ;;  %v1722_v55 = vsel %vm6715_vm3, %v1717_v5, %v6662_v63  ;;  %v1746_v38 = vsel %vm6715_vm3, %v1741_v9, %v6684_v1  ;;  %v2335_v16 = vrot.slane %v6721_v36, 5  ;;  %v2287_v47 = vld [vmem:[#allocation2 + $0x3c] sm:$0xe]  ;;  %v5962_v35 = vld [vmem:[%s7670_s4 + $0xb0] sm:$0xff]   ;;  %v6784_v5 = vld [vmem:[#allocation2 + $0x40] sm:$0xf] }
 0x19a   : > { %5508 = vmatprep.subr.bf16.mxu1 %v5956_v57  ;;  %v4822_v18 = vcombine.low %v1712_v45, %v1722_v55  ;;  %v1731_v20 = vrot.slane %v1730_v10, 4  ;;  %v2329_v21 = vsel %vm6651_vm6, %v2327_v51, %v2328_v3  ;;  %v2333_v61 = vsel %vm6651_vm6, %v4869_v62, %v2332_v14  ;;  %v6787_v10 = vld [vmem:[#allocation2 + $0x44] sm:$0x1]  ;;  %v6792_v55 = vld [vmem:[#allocation2 + $0x30] sm:$0xf] }
 0x19b   : > { %v4888_v63 = vcombine.low %v2326_v13, %v2329_v21  ;;  %v2334_v6 = vrot.slane %v2332_v14, 4  ;;  %v1748_v23 = vshrl.u32 %v6728_v15, 16  ;;  %v1751_v1 = vshll.u32 %v6728_v15, 16 }
 0x19c   : > { %5434 = vmatprep.mubr.msk.bf16.mxu0 %vm441_vm0, %v4822_v18  ;;  %v1736_v26 = vsel %vm6715_vm3, %v1731_v20, %v6674_v2  ;;  %v1757_v11 = vshll.u32 %v6695_v42, 16  ;;  %v1761_v29 = vshrl.u32 %v6695_v42, 16  ;;  %v1767_v30 = vshll.u32 %v6697_v53, 16  ;;  %v5959_v2 = vld [vmem:[%s7670_s4 + $0x8] sm:$0xff]  }
 0x19d   : > { %5509 = vmatpush3.bf16.msra.mxu1 %v5956_v57  ;;  %v4823_v31 = vcombine.low %v1736_v26, %v1746_v38  ;;  %5494 = vmatprep.mubr.msk.bf16.mxu1 %vm441_vm0, %v4888_v63  ;;  %v2336_v33 = vsel %vm6651_vm6, %v2334_v6, %v2335_v16  ;;  %v1750_v27 = vrot.slane %v1748_v23, 4  ;;  %v1753_v34 = vrot.slane %v1751_v1, 5 }
 0x19e   : > { %5510 = vmatprep.subr.bf16.mxu1 %v5957_v40  ;;  %v4889_v41 = vcombine.low %v2333_v61, %v2336_v33  ;;  %v1759_v32 = vrot.slane %v1757_v11, 5  ;;  %v1763_v44 = vrot.slane %v1761_v29, 4  ;;  %v1769_v43 = vrot.slane %v1767_v30, 5  ;;  %v5963_v11 = vld [vmem:[%s7670_s4 + $0x18] sm:$0xff]  }
 0x19f   : > { %5435 = vmatmul.mubr.msk.bf16.vlgmr.msra.gmra.mrb[20].mxu0 %vm441_vm0, %v4823_v31  ;;  %v1754_v53 = vor.u32 %v1753_v34, %v1750_v27  ;;  %v1772_v50 = vshrl.u32 %v6748_v25, 16  ;;  %v1775_v12 = vshll.u32 %v6748_v25, 16  ;;  %v1781_v7 = vshll.u32 %v6711_v49, 16  ;;  %v5965_v29 = vld [vmem:[%s7670_s4 + $0xb8] sm:$0xff]  }
 0x1a0   : > { %5495 = vmatmul.mubr.msk.bf16.gmra.mrb[4].mxu1 %vm441_vm0, %v4889_v41  ;;  %v1764_v59 = vor.u32 %v1763_v44, %v1759_v32  ;;  %v1785_v46 = vshrl.u32 %v6711_v49, 16  ;;  %v1791_v48 = vshll.u32 %v6721_v36, 16  ;;  %5451 = vmatpush3.bf16.msra.mxu0 %v6347_v39  ;;  %v4870_v57 = vrot.slane %v2286_v37, 9  ;;  %v6815_v34 = vld [vmem:[#allocation2 + $0x3c] sm:$0xf]  ;;  %v5966_v37 = vld [vmem:[%s7670_s4 + $0x20] sm:$0xff]  }
 0x1a1   : > { %v1755_v8 = vrot.slane %v1754_v53, 4  ;;  %v1774_v0 = vrot.slane %v1772_v50, 4  ;;  %v1777_v3 = vrot.slane %v1775_v12, 5  ;;  %v1783_v4 = vrot.slane %v1781_v7, 5  ;;  %5511 = vmatpush3.bf16.msra.mxu1 %v5957_v40  ;;  %5452 = vmatprep.subr.bf16.mxu0 %v5959_v2  ;;  %v6833_v7 = vld [vmem:[#allocation2 + $0x4c] sm:$0xf] }
 0x1a2   : > { %v1765_v9 = vrot.slane %v1764_v59, 4  ;;  %v1787_v62 = vrot.slane %v1785_v46, 4  ;;  %v1793_v36 = vrot.slane %v1791_v48, 5  ;;  %v2339_v39 = vrot.slane %v6770_v54, 5  ;;  %5512 = vmatprep.subr.bf16.mxu1 %v5960_v17 }
 0x1a3   : > { %v1760_v13 = vsel %vm6715_vm3, %v1755_v8, %v1759_v32  ;;  %v1778_v51 = vor.u32 %v1777_v3, %v1774_v0  ;;  %v2342_v14 = vrot.slane %v6779_v60, 5  ;;  %v4871_v45 = vrot.slane %v2287_v47, 9  ;;  %v6826_v47 = vld [vmem:[%s7670_s4 + $0xc0] sm:$0xff]   ;;  %v2289_v8 = vld [vmem:[#allocation2 + $0x54] sm:$0xe] }
 0x1a4   : > { %v1770_v38 = vsel %vm6715_vm3, %v1765_v9, %v1769_v43  ;;  %v1788_v16 = vor.u32 %v1787_v62, %v1783_v4  ;;  %v2340_v40 = vsel %vm6651_vm6, %v4870_v57, %v2339_v39  ;;  %v2341_v18 = vrot.slane %v2339_v39, 4  ;;  %5453 = vmatpush3.bf16.msra.mxu0 %v5959_v2  ;;  %v2288_v43 = vld [vmem:[#allocation2 + $0x48] sm:$0xe]  ;;  %v6836_v57 = vld [vmem:[#allocation2 + $0x50] sm:$0x1] }
 0x1a5   : > { %v4824_v20 = vcombine.low %v1760_v13, %v1770_v38  ;;  %v1779_v21 = vrot.slane %v1778_v51, 4  ;;  %v2346_v61 = vrot.slane %v6784_v5, 5  ;;  %v2349_v63 = vrot.slane %v6787_v10, 5  ;;  %5513 = vmatpush3.bf16.msra.mxu1 %v5960_v17  ;;  %5454 = vmatprep.subr.bf16.mxu0 %v5961_v58  ;;  %v6841_v9 = vld [vmem:[#allocation2 + $0x58] sm:$0xf] }
 0x1a6   : > { %v1789_v6 = vrot.slane %v1788_v16, 4  ;;  %v2343_v23 = vsel %vm6651_vm6, %v2341_v18, %v2342_v14  ;;  %v1796_v1 = vshrl.u32 %v6792_v55, 16  ;;  %v1799_v26 = vshll.u32 %v6792_v55, 16  ;;  %5514 = vmatprep.subr.bf16.mxu1 %v5962_v35  ;;  %v6846_v13 = vld [vmem:[#allocation2 + $0x5c] sm:$0x1] }
 0x1a7   : > { %5438 = vmatprep.mubr.msk.bf16.mxu0 %vm441_vm0, %v4824_v20  ;;  %v1784_v30 = vsel %vm6715_vm3, %v1779_v21, %v1783_v4  ;;  %v4890_v31 = vcombine.low %v2340_v40, %v2343_v23  ;;  %v2347_v33 = vsel %vm6651_vm6, %v4871_v45, %v2346_v61  ;;  %v2348_v27 = vrot.slane %v2346_v61, 4  ;;  %v6848_v51 = vld [vmem:[#allocation2 + $0x48] sm:$0xf] }
 0x1a8   : > { %v1794_v2 = vsel %vm6715_vm3, %v1789_v6, %v1793_v36  ;;  %v1798_v41 = vrot.slane %v1796_v1, 4  ;;  %v1801_v32 = vrot.slane %v1799_v26, 5  ;;  %v1805_v44 = vshll.u32 %v6770_v54, 16  ;;  %5455 = vmatpush3.bf16.msra.mxu0 %v5961_v58  ;;  %v5968_v40 = vld [vmem:[%s7670_s4 + $0x28] sm:$0xff]  }
 0x1a9   : > { %v4825_v17 = vcombine.low %v1784_v30, %v1794_v2  ;;  %5498 = vmatprep.mubr.msk.bf16.mxu1 %vm441_vm0, %v4890_v31  ;;  %v2350_v53 = vsel %vm6651_vm6, %v2348_v27, %v2349_v63  ;;  %v1809_v50 = vshrl.u32 %v6770_v54, 16  ;;  %v1815_v12 = vshll.u32 %v6779_v60, 16  ;;  %5515 = vmatpush3.bf16.msra.mxu1 %v5962_v35  ;;  %v6861_v30 = vld [vmem:[#allocation2 + $0x54] sm:$0xf] }
 0x1aa   : > { %v4891_v58 = vcombine.low %v2347_v33, %v2350_v53  ;;  %v1802_v59 = vor.u32 %v1801_v32, %v1798_v41  ;;  %v1807_v46 = vrot.slane %v1805_v44, 5  ;;  %v1820_v48 = vshrl.u32 %v6815_v34, 16  ;;  %5456 = vmatprep.subr.bf16.mxu0 %v5963_v11  ;;  %5516 = vmatprep.subr.bf16.mxu1 %v5965_v29  ;;  %v6870_v41 = vld [vmem:[%s7670_s4 + $0x180] sm:$0xff]  }
 0x1ab   : > { %5439 = vmatmul.mubr.msk.bf16.gmra.mrb[24].mxu0 %vm441_vm0, %v4825_v17  ;;  %v1811_v0 = vrot.slane %v1809_v50, 4  ;;  %v1817_v3 = vrot.slane %v1815_v12, 5  ;;  %v1823_v4 = vshll.u32 %v6815_v34, 16  ;;  %v1829_v60 = vshll.u32 %v6784_v5, 16 }
 0x1ac   : > { %5499 = vmatmul.mubr.msk.bf16.gmra.mrb[8].mxu1 %vm441_vm0, %v4891_v58  ;;  %v1803_v35 = vrot.slane %v1802_v59, 4  ;;  %v1822_v62 = vrot.slane %v1820_v48, 4  ;;  %v1833_v36 = vshrl.u32 %v6784_v5, 16  ;;  %v1839_v39 = vshll.u32 %v6787_v10, 16  ;;  %5457 = vmatpush3.bf16.msra.mxu0 %v5963_v11 }
 0x1ad   : > { %v1812_v14 = vor.u32 %v1811_v0, %v1807_v46  ;;  %v1825_v45 = vrot.slane %v1823_v4, 5  ;;  %v1831_v38 = vrot.slane %v1829_v60, 5  ;;  %v4872_v16 = vrot.slane %v2288_v43, 9  ;;  %5458 = vmatprep.subr.bf16.mxu0 %v5966_v37  ;;  %5517 = vmatpush3.bf16.msra.mxu1 %v5965_v29 }
 0x1ae   : > { %v1808_v18 = vsel %vm6715_vm3, %v1803_v35, %v1807_v46  ;;  %v1835_v20 = vrot.slane %v1833_v36, 4  ;;  %v1841_v10 = vrot.slane %v1839_v39, 5  ;;  %v2353_v21 = vrot.slane %v6833_v7, 5  ;;  %5534 = vmatprep.subr.bf16.mxu1 %v6826_v47  ;;  %v5964_v39 = vld [vmem:[#allocation2 + $0xc] sm:$0xff]  }
 0x1af   : > { %v1813_v61 = vrot.slane %v1812_v14, 4  ;;  %v1826_v63 = vor.u32 %v1825_v45, %v1822_v62  ;;  %v2356_v6 = vrot.slane %v6836_v57, 5  ;;  %v4873_v23 = vrot.slane %v2289_v8, 9 }
 0x1b0   : > { %v1836_v1 = vor.u32 %v1835_v20, %v1831_v38  ;;  %v2354_v26 = vsel %vm6651_vm6, %v4872_v16, %v2353_v21  ;;  %v2355_v11 = vrot.slane %v2353_v21, 4  ;;  %v2360_v29 = vrot.slane %v6841_v9, 5  ;;  %5459 = vmatpush3.bf16.msra.mxu0 %v5966_v37 }
 0x1b1   : > { %v1818_v31 = vsel %vm6715_vm3, %v1813_v61, %v1817_v3  ;;  %v1827_v33 = vrot.slane %v1826_v63, 4  ;;  %v2363_v27 = vrot.slane %v6846_v13, 5  ;;  %v1844_v2 = vshrl.u32 %v6848_v51, 16  ;;  %5460 = vmatprep.subr.bf16.mxu0 %v5968_v40 }
 0x1b2   : > { %v4826_v32 = vcombine.low %v1808_v18, %v1818_v31  ;;  %v1837_v44 = vrot.slane %v1836_v1, 4  ;;  %v2357_v43 = vsel %vm6651_vm6, %v2355_v11, %v2356_v6  ;;  %v2361_v37 = vsel %vm6651_vm6, %v4873_v23, %v2360_v29  ;;  %v2818_v23 = vld [vmem:[#allocation2 + $0xc] sm:$0xf]  ;;  %v6899_v11 = vld [vmem:[#allocation2 + $0x10] sm:$0xf] }
 0x1b3   : > { %v1832_v17 = vsel %vm6715_vm3, %v1827_v33, %v1831_v38  ;;  %v4892_v53 = vcombine.low %v2354_v26, %v2357_v43  ;;  %v2362_v50 = vrot.slane %v2360_v29, 4  ;;  %v1846_v12 = vrot.slane %v1844_v2, 4  ;;  %v5969_v43 = vld [vmem:[#allocation2 + $0x18] sm:$0xff]  }
 0x1b4   : > { %5442 = vmatprep.mubr.msk.bf16.mxu0 %vm441_vm0, %v4826_v32  ;;  %v1842_v58 = vsel %vm6715_vm3, %v1837_v44, %v1841_v10  ;;  %v1847_v59 = vshll.u32 %v6848_v51, 16  ;;  %v1853_v46 = vshll.u32 %v6833_v7, 16  ;;  %v1857_v48 = vshrl.u32 %v6833_v7, 16  ;;  %5461 = vmatpush3.bf16.msra.mxu0 %v5968_v40 }
 0x1b5   : > { %v4827_v8 = vcombine.low %v1832_v17, %v1842_v58  ;;  %5502 = vmatprep.mubr.msk.bf16.mxu1 %vm441_vm0, %v4892_v53  ;;  %v2364_v0 = vsel %vm6651_vm6, %v2362_v50, %v2363_v27  ;;  %v1863_v3 = vshll.u32 %v6836_v57, 16  ;;  %v1868_v4 = vshrl.u32 %v6861_v30, 16  ;;  %5646 = vmatprep.subr.bf16.mxu0 %v6870_v41  ;;  %v6907_v27 = vld [vmem:[#allocation2 + $0x14] sm:$0x1] }
 0x1b6   : > { %v4893_v60 = vcombine.low %v2361_v37, %v2364_v0  ;;  %v1849_v35 = vrot.slane %v1847_v59, 5  ;;  %v1855_v62 = vrot.slane %v1853_v46, 5  ;;  %v1859_v36 = vrot.slane %v1857_v48, 4  ;;  %v5971_v59 = vld [vmem:[#allocation2 + $0x24] sm:$0xff]   ;;  %v2821_v0 = vld [vmem:[#allocation2 + $0x18] sm:$0xf] }
 0x1b7   : > { %5443 = vmatmul.mubr.msk.bf16.gmra.mrb[28].mxu0 %vm441_vm0, %v4827_v8  ;;  %v1870_v14 = vrot.slane %v1868_v4, 4  ;;  %v1871_v45 = vshll.u32 %v6861_v30, 16  ;;  %v1877_v38 = vshll.u32 %v6841_v9, 16  ;;  %v1881_v40 = vshrl.u32 %v6841_v9, 16 }
 0x1b8   : > { %5503 = vmatmul.mubr.msk.bf16.gmra.mrb[12].mxu1 %vm441_vm0, %v4893_v60  ;;  %v1850_v16 = vor.u32 %v1849_v35, %v1846_v12  ;;  %v1860_v57 = vor.u32 %v1859_v36, %v1855_v62  ;;  %v1887_v10 = vshll.u32 %v6846_v13, 16  ;;  %v1865_v63 = vrot.slane %v1863_v3, 5  ;;  %v6914_v12 = vld [vmem:[#allocation2 + $0x1c] sm:$0xf] }
 0x1b9   : > { %5518 = vmatprep.mubr.msk.bf16.mxu1 %vm441_vm0, %v5964_v39  ;;  %v1873_v18 = vrot.slane %v1871_v45, 5  ;;  %v1879_v20 = vrot.slane %v1877_v38, 5  ;;  %v1883_v6 = vrot.slane %v1881_v40, 4  ;;  %v4844_v26 = vcombine.low %v6676_v22, %v6630_v28  ;;  %v5974_v28 = vld [vmem:[%s7670_s4 + $0xc8] sm:$0xff]   ;;  %v4211_v45 = vld [vmem:[#allocation2 + $0x18] sm:$0xe] }
 0x1ba   : > { %v1851_v21 = vrot.slane %v1850_v16, 4  ;;  %v1861_v61 = vrot.slane %v1860_v57, 4  ;;  %v4845_v13 = vcombine.low %v6678_v19, %v6658_v56  ;;  %v1889_v44 = vrot.slane %v1887_v10, 5  ;;  %v5977_v16 = vld [vmem:[%s7670_s4 + $0xd0] sm:$0xff]  }
 0x1bb   : > { %v1874_v1 = vor.u32 %v1873_v18, %v1870_v14  ;;  %v1884_v33 = vor.u32 %v1883_v6, %v1879_v20  ;;  %v2843_v22 = vshrl.u32 %v2818_v23, 16  ;;  %v2846_v17 = vshll.u32 %v2818_v23, 16  ;;  %v6942_v18 = vld [vmem:[#allocation2 + $0x20] sm:$0x1]  ;;  %v7018_v56 = vld [vmem:[%s7670_s4 + $0x190] sm:$0xff]  }
 0x1bc   : > { %v1856_v29 = vsel %vm6715_vm3, %v1851_v21, %v1855_v62  ;;  %v1866_v31 = vsel %vm6715_vm3, %v1861_v61, %v1865_v63  ;;  %v2852_v53 = vshll.u32 %v6899_v11, 16  ;;  %v2856_v50 = vshrl.u32 %v6899_v11, 16  ;;  %v6927_v62 = vld [vmem:[#allocation2 + $0x1c] sm:$0xf]  ;;  %7719 = vst [vmem:[#allocation4_spill] sm:$0xff] %v7018_v56 }
 0x1bd   : > { %v4828_v2 = vcombine.low %v1856_v29, %v1866_v31  ;;  %v1875_v32 = vrot.slane %v1874_v1, 4  ;;  %v1885_v37 = vrot.slane %v1884_v33, 4  ;;  %v4846_v46 = vcombine.low %v6728_v15, %v6695_v42  ;;  %v2824_v33 = vld [vmem:[#allocation2 + $0x24] sm:$0xf]  ;;  %v5991_v15 = vld [vmem:[%s7670_s4 + $0xe8] sm:$0xff]  }
 0x1be   : > { %v2845_v48 = vrot.slane %v2843_v22, 4  ;;  %v2862_v8 = vshll.u32 %v6907_v27, 16  ;;  %v2848_v4 = vrot.slane %v2846_v17, 5  ;;  %v6925_v60 = vrot.slane %v2852_v53, 5  ;;  %v6956_v22 = vld [vmem:[#allocation2 + $0x28] sm:$0xf] }
 0x1bf   : > { %5446 = vmatprep.mubr.msk.bf16.mxu0 %vm441_vm0, %v4828_v2  ;;  %v1880_v58 = vsel %vm6715_vm3, %v1875_v32, %v1879_v20  ;;  %v1890_v3 = vsel %vm6715_vm3, %v1885_v37, %v1889_v44  ;;  %v2858_v35 = vrot.slane %v2856_v50, 4  ;;  %v4847_v39 = vcombine.low %v6748_v25, %v6711_v49  ;;  %v6944_v20 = vld [vmem:[#allocation2 + $0x20] sm:$0x1]  ;;  %v5975_v37 = vld [vmem:[#allocation2 + $0x30] sm:$0xff]   ;;  %v7125_v17 = vld [vmem:[#allocation2 + $0x48] sm:$0xe] }
 0x1c0   : > { %5519 = vmatmul.mubr.msk.bf16.vlgmr.msra.gmra.mrb[0].mxu1 %vm441_vm0, %v5969_v43  ;;  %v4829_v36 = vcombine.low %v1880_v58, %v1890_v3  ;;  %v4848_v14 = vcombine.low %v6792_v55, %v6770_v54  ;;  %v4245_v38 = vrot.slane %v6914_v12, 5  ;;  %v2849_v40 = vor.u32 %v2848_v4, %v2845_v48  ;;  %v6967_v58 = vld [vmem:[#allocation2 + $0x2c] sm:$0x1] }
 0x1c1   : > { %5522 = vmatprep.mubr.msk.bf16.mxu1 %vm441_vm0, %v5971_v59  ;;  %5535 = vmatpush3.bf16.msra.mxu1 %v6826_v47  ;;  %v2859_v47 = vor.u32 %v2858_v35, %v6925_v60  ;;  %v2867_v10 = vshrl.u32 %v2821_v0, 16  ;;  %v6947_v21 = vrot.slane %v2862_v8, 5  ;;  %v2870_v63 = vshll.u32 %v2821_v0, 16  ;;  %v5976_v59 = vld [vmem:[#allocation2 + $0x3c] sm:$0xff]   ;;  %v6972_v48 = vld [vmem:[%s7670_s4 + $0x188] sm:$0xff]  }
 0x1c2   : > { %5536 = vmatprep.subr.bf16.mxu1 %v5974_v28  ;;  %5447 = vmatmul.mubr.msk.bf16.gmra.mrb[32].mxu0 %vm441_vm0, %v4829_v36  ;;  %v4247_v61 = vrot.slane %v4245_v38, 4  ;;  %v2876_v6 = vshll.u32 %v6927_v62, 16  ;;  %v5086_v1 = vrot.slane %v4211_v45, 9  ;;  %v2880_v31 = vshrl.u32 %v6927_v62, 16  ;;  %7718 = vst [vmem:[#allocation3_spill] sm:$0xff] %v6972_v48  ;;  %v6985_v35 = vld [vmem:[%s7670_s4 + $0xe0] sm:$0xff]  }
 0x1c3   : > { %5462 = vmatprep.mubr.msk.bf16.mxu0 %vm441_vm0, %v4844_v26  ;;  %v2860_v23 = vrot.slane %v2859_v47, 4  ;;  %v2869_v29 = vrot.slane %v2867_v10, 4  ;;  %v4248_v2 = vrot.slane %v6942_v18, 5  ;;  %v2872_v32 = vrot.slane %v2870_v63, 5  ;;  %v5982_v26 = vld [vmem:[%s7670_s4 + $0xd8] sm:$0xff]  }
 0x1c4   : > { %v6953_v44 = vrot.slane %v2876_v6, 5  ;;  %v2886_v43 = vshll.u32 %v6944_v20, 16  ;;  %v2850_v53 = vrot.slane %v2849_v40, 4  ;;  %v2882_v50 = vrot.slane %v2880_v31, 4  ;;  %v6990_v47 = vld [vmem:[#allocation2 + $0x28] sm:$0xf] }
 0x1c5   : > { %5537 = vmatpush3.bf16.msra.mxu1 %v5974_v28  ;;  %v6965_v28 = vsel %vm6651_vm6, %v5086_v1, %v4245_v38  ;;  %v2865_v8 = vsel %vm6715_vm3, %v2860_v23, %v6947_v21  ;;  %v6979_v0 = vsel %vm6651_vm6, %v4247_v61, %v4248_v2  ;;  %v2873_v3 = vor.u32 %v2872_v32, %v2869_v29  ;;  %v4212_v6 = vld [vmem:[#allocation2 + $0x24] sm:$0xe]  ;;  %v7114_v2 = vld [vmem:[#allocation2 + $0x4c] sm:$0xf] }
 0x1c6   : > { %5538 = vmatprep.subr.bf16.mxu1 %v5977_v16  ;;  %v2891_v4 = vshrl.u32 %v2824_v33, 16  ;;  %v2883_v36 = vor.u32 %v2882_v50, %v6953_v44  ;;  %v2894_v45 = vshll.u32 %v2824_v33, 16  ;;  %v2900_v38 = vshll.u32 %v6956_v22, 16  ;;  %v6996_v33 = vld [vmem:[#allocation2 + $0x34] sm:$0xf] }
 0x1c7   : > { %v2904_v40 = vshrl.u32 %v6956_v22, 16  ;;  %v2874_v10 = vrot.slane %v2873_v3, 4  ;;  %v2888_v21 = vrot.slane %v2886_v43, 5  ;;  %v2910_v63 = vshll.u32 %v6967_v58, 16  ;;  %v4213_v50 = vld [vmem:[#allocation2 + $0x30] sm:$0xe] }
 0x1c8   : > { %5523 = vmatmul.mubr.msk.bf16.gmra.mrb[4].mxu1 %vm441_vm0, %v5975_v37  ;;  %v2893_v61 = vrot.slane %v2891_v4, 4  ;;  %v2884_v23 = vrot.slane %v2883_v36, 4  ;;  %v2896_v1 = vrot.slane %v2894_v45, 5  ;;  %v6994_v29 = vrot.slane %v2900_v38, 5  ;;  %v2827_v37 = vld [vmem:[#allocation2 + $0x30] sm:$0xf] }
 0x1c9   : > { %5526 = vmatprep.mubr.msk.bf16.mxu1 %vm441_vm0, %v5976_v59  ;;  %5539 = vmatpush3.bf16.msra.mxu1 %v5977_v16  ;;  %v2906_v31 = vrot.slane %v2904_v40, 4  ;;  %v2855_v16 = vsel %vm6715_vm3, %v2850_v53, %v6925_v60  ;;  %v4252_v43 = vrot.slane %v6990_v47, 5  ;;  %v7023_v53 = vld [vmem:[#allocation2 + $0x2c] sm:$0x1]  ;;  %v7031_v59 = vld [vmem:[#allocation2 + $0x38] sm:$0x1]  ;;  %v2879_v36 = vsel %vm6715_vm3, %v2874_v10, %v6953_v44 }
 0x1ca   : > { %5540 = vmatprep.subr.bf16.mxu1 %v5982_v26  ;;  %5463 = vmatmul.mubr.msk.bf16.vlgmr.msra.gmra.mrb[20].mxu0 %vm441_vm0, %v4845_v13  ;;  %v2889_v19 = vsel %vm6715_vm3, %v2884_v23, %v2888_v21  ;;  %v2897_v13 = vor.u32 %v2896_v1, %v2893_v61  ;;  %v7026_v42 = vcombine.low %v2855_v16, %v2865_v8  ;;  %v4259_v3 = vrot.slane %v6996_v33, 5  ;;  %v5981_v4 = vld [vmem:[#allocation2 + $0x48] sm:$0xff]   ;;  %v7038_v45 = vld [vmem:[#allocation2 + $0x34] sm:$0xf]  ;;  %v2830_v1 = vld [vmem:[#allocation2 + $0x3c] sm:$0xf] }
 0x1cb   : > { %5466 = vmatprep.mubr.msk.bf16.mxu0 %vm441_vm0, %v4846_v46  ;;  %5647 = vmatpush3.bf16.msra.mxu0 %v6870_v41  ;;  %v2907_v60 = vor.u32 %v2906_v31, %v6994_v29  ;;  %v5087_v41 = vrot.slane %v4212_v6, 9  ;;  %v4254_v46 = vrot.slane %v4252_v43, 4  ;;  %v2912_v8 = vrot.slane %v2910_v63, 5  ;;  %v5984_v40 = vld [vmem:[#allocation2 + $0x54] sm:$0xff]   ;;  %v7050_v16 = vld [vmem:[#allocation2 + $0x40] sm:$0xf] }
 0x1cc   : > { %5648 = vmatprep.subr.bf16.mxu0 %v6972_v48  ;;  %v2915_v38 = vshrl.u32 %v2827_v37, 16  ;;  %v7040_v21 = vcombine.low %v2879_v36, %v2889_v19  ;;  %v4255_v61 = vrot.slane %v7023_v53, 5  ;;  %v5088_v6 = vrot.slane %v4213_v50, 9 }
 0x1cd   : > { %5541 = vmatpush3.bf16.msra.mxu1 %v5982_v26  ;;  %v2908_v26 = vrot.slane %v2907_v60, 4  ;;  %v2918_v23 = vshll.u32 %v2827_v37, 16  ;;  %v2898_v31 = vrot.slane %v2897_v13, 4  ;;  %v7047_v44 = vsel %vm6651_vm6, %v5087_v41, %v4252_v43  ;;  %v7057_v37 = vld [vmem:[%s7670_s4 + $0x198] sm:$0xff]  }
 0x1ce   : > { %5542 = vmatprep.subr.bf16.mxu1 %v6985_v35  ;;  %v4262_v10 = vrot.slane %v7031_v59, 5  ;;  %v2917_v63 = vrot.slane %v2915_v38, 4  ;;  %7720 = vst [vmem:[#allocation5_spill] sm:$0xff] %v7057_v37  ;;  %v7061_v19 = vsel %vm6651_vm6, %v4254_v46, %v4255_v61  ;;  %v7065_v43 = vsel %vm6651_vm6, %v5088_v6, %v4259_v3  ;;  %v7067_v13 = vld [vmem:[#allocation2 + $0x38] sm:$0x1]  ;;  %v7081_v46 = vld [vmem:[%s7670_s4 + $0xf0] sm:$0xff]  }
 0x1cf   : > { %5649 = vmatpush3.bf16.msra.mxu0 %v6972_v48  ;;  %v2920_v60 = vrot.slane %v2918_v23, 5  ;;  %v2924_v50 = vshll.u32 %v7038_v45, 16  ;;  %v2913_v41 = vsel %vm6715_vm3, %v2908_v26, %v2912_v8  ;;  %v2928_v36 = vshrl.u32 %v7038_v45, 16  ;;  %v7086_v26 = vld [vmem:[#allocation2 + $0x40] sm:$0xf] }
 0x1d0   : > { %5527 = vmatmul.mubr.msk.bf16.gmra.mrb[8].mxu1 %vm441_vm0, %v5981_v4  ;;  %5650 = vmatprep.subr.bf16.mxu0 %v7018_v56  ;;  %v4261_v4 = vrot.slane %v4259_v3, 4  ;;  %v2939_v38 = vshrl.u32 %v2830_v1, 16  ;;  %v2942_v61 = vshll.u32 %v2830_v1, 16  ;;  %v2948_v3 = vshll.u32 %v7050_v16, 16  ;;  %v7101_v23 = vld [vmem:[%s7670_s4 + $0x1a0] sm:$0xff]  }
 0x1d1   : > { %5530 = vmatprep.mubr.msk.bf16.mxu1 %vm441_vm0, %v5984_v40  ;;  %5543 = vmatpush3.bf16.msra.mxu1 %v6985_v35  ;;  %v2921_v40 = vor.u32 %v2920_v60, %v2917_v63  ;;  %v7083_v35 = vrot.slane %v2924_v50, 5  ;;  %v2930_v49 = vrot.slane %v2928_v36, 4  ;;  %v2934_v25 = vshll.u32 %v7067_v13, 16  ;;  %7721 = vst [vmem:[#allocation6_spill] sm:$0xff] %v7101_v23  ;;  %v4214_v63 = vld [vmem:[#allocation2 + $0x3c] sm:$0xe] }
 0x1d2   : > { %5467 = vmatmul.mubr.msk.bf16.gmra.mrb[24].mxu0 %vm441_vm0, %v4847_v39  ;;  %5544 = vmatprep.subr.bf16.mxu1 %v5991_v15  ;;  %v7094_v39 = vld [vmem:[#allocation2 + $0x44] sm:$0x1]  ;;  %v2941_v8 = vrot.slane %v2939_v38, 4  ;;  %v2952_v6 = vshrl.u32 %v7050_v16, 16  ;;  %v2903_v54 = vsel %vm6715_vm3, %v2898_v31, %v6994_v29  ;;  %v7106_v1 = vrot.slane %v2948_v3, 5 }
 0x1d3   : > { %5470 = vmatprep.mubr.msk.bf16.mxu0 %vm441_vm0, %v4848_v14  ;;  %5651 = vmatpush3.bf16.msra.mxu0 %v7018_v56  ;;  %v2922_v55 = vrot.slane %v2921_v40, 4  ;;  %v2944_v14 = vrot.slane %v2942_v61, 5  ;;  %v5989_v60 = vld [vmem:[#allocation2 + $0x60] sm:$0xff]   ;;  %v7110_v50 = vsel %vm6651_vm6, %v4261_v4, %v4262_v10  ;;  %v2931_v36 = vor.u32 %v2930_v49, %v7083_v35  ;;  %v2833_v10 = vld [vmem:[#allocation2 + $0x48] sm:$0xf] }
 0x1d4   : > { %5652 = vmatprep.subr.bf16.mxu0 %v7057_v37  ;;  %v2954_v38 = vrot.slane %v2952_v6, 4  ;;  %v4266_v32 = vrot.slane %v7086_v26, 5  ;;  %v4956_v29 = vcombine.low %v2903_v54, %v2913_v41  ;;  %v7120_v61 = vld [vmem:[#allocation2 + $0x44] sm:$0x1]  ;;  %v2936_v3 = vrot.slane %v2934_v25, 5  ;;  %v7133_v41 = vld [vmem:[%s7670_s4 + $0x1a8] sm:$0xff]  }
 0x1d5   : > { %5545 = vmatpush3.bf16.msra.mxu1 %v5991_v15  ;;  %v2945_v40 = vor.u32 %v2944_v14, %v2941_v8  ;;  %v2958_v15 = vshll.u32 %v7094_v39, 16  ;;  %v2932_v4 = vrot.slane %v2931_v36, 4  ;;  %7722 = vst [vmem:[#allocation7_spill] sm:$0xff] %v7133_v41  ;;  %v2927_v25 = vsel %vm6715_vm3, %v2922_v55, %v7083_v35  ;;  %v7140_v14 = vld [vmem:[#allocation2 + $0x50] sm:$0x1] }
 0x1d6   : > { %5562 = vmatprep.subr.bf16.mxu1 %v7081_v46  ;;  %v2955_v49 = vor.u32 %v2954_v38, %v7106_v1  ;;  %v4268_v6 = vrot.slane %v4266_v32, 4  ;;  %v5089_v54 = vrot.slane %v4214_v63, 9  ;;  %7723 = vst [vmem:[#allocation8_spill] sm:$0xff] %v7140_v14  ;;  %v4269_v38 = vrot.slane %v7120_v61, 5  ;;  %v7146_v31 = vld [vmem:[#allocation2 + $0x4c] sm:$0xf] }
 0x1d7   : > { %5653 = vmatpush3.bf16.msra.mxu0 %v7057_v37  ;;  %v2946_v36 = vrot.slane %v2945_v40, 4  ;;  %v2963_v57 = vshrl.u32 %v2833_v10, 16  ;;  %v7724_v8 = vcombine.low %v6815_v34, %v6784_v5  ;;  %v2960_v55 = vrot.slane %v2958_v15, 5  ;;  %v7167_v15 = vld [vmem:[#allocation2 + $0x50] sm:$0x1] }
 0x1d8   : > { %5531 = vmatmul.mubr.msk.bf16.gmra.mrb[12].mxu1 %vm441_vm0, %v5989_v60  ;;  %5654 = vmatprep.subr.bf16.mxu0 %v7101_v23  ;;  %v4273_v60 = vrot.slane %v7114_v2, 5  ;;  %v2956_v35 = vrot.slane %v2955_v49, 4  ;;  %v7154_v63 = vsel %vm6651_vm6, %v5089_v54, %v4266_v32  ;;  %v5090_v37 = vrot.slane %v7125_v17, 9  ;;  %v7182_v54 = vld [vmem:[#allocation2 + $0x5c] sm:$0x1] }
 0x1d9   : > { %5546 = vmatprep.mubr.msk.bf16.mxu1 %vm441_vm0, %v7026_v42  ;;  %v2937_v42 = vsel %vm6715_vm3, %v2932_v4, %v2936_v3  ;;  %v2836_v4 = vld [vmem:[#allocation2 + $0x54] sm:$0xf]  ;;  %v7725_v40 = vcombine.low %v6848_v51, %v6833_v7  ;;  %v7164_v5 = vsel %vm6651_vm6, %v4268_v6, %v4269_v38  ;;  %v4276_v34 = vrot.slane %v7140_v14, 5  ;;  %v5996_v6 = vld [vmem:[%s7670_s4 + $0xf8] sm:$0xff]  }
 0x1da   : > { %5471 = vmatmul.mubr.msk.bf16.gmra.mrb[28].mxu0 %vm441_vm0, %v7724_v8  ;;  %v2965_v32 = vrot.slane %v2963_v57, 4  ;;  %v2966_v3 = vshll.u32 %v2833_v10, 16  ;;  %v7170_v17 = vcombine.low %v2927_v25, %v2937_v42  ;;  %v4275_v49 = vrot.slane %v4273_v60, 4  ;;  %v7174_v8 = vld [vmem:[#allocation2 + $0x58] sm:$0xf] }
 0x1db   : > { %5474 = vmatprep.mubr.msk.bf16.mxu0 %vm441_vm0, %v7725_v40  ;;  %5655 = vmatpush3.bf16.msra.mxu0 %v7101_v23  ;;  %v2972_v7 = vshll.u32 %v7146_v31, 16  ;;  %v2976_v51 = vshrl.u32 %v7146_v31, 16  ;;  %v2951_v57 = vsel %vm6715_vm3, %v2946_v36, %v7106_v1  ;;  %v2987_v25 = vshrl.u32 %v2836_v4, 16  ;;  %v7189_v48 = vld [vmem:[#allocation2 + $0x58] sm:$0xf] }
 0x1dc   : > { %5656 = vmatprep.subr.bf16.mxu0 %v7133_v41  ;;  %v2968_v10 = vrot.slane %v2966_v3, 5  ;;  %v2990_v42 = vshll.u32 %v2836_v4, 16  ;;  %v2961_v38 = vsel %vm6715_vm3, %v2956_v35, %v2960_v55  ;;  %v2982_v56 = vshll.u32 %v7167_v15, 16  ;;  %7726 = vst [vmem:[#allocation9_spill] sm:$0xff] %v7189_v48 }
 0x1dd   : > { %v7186_v40 = vrot.slane %v2972_v7, 5  ;;  %v2978_v23 = vrot.slane %v2976_v51, 4  ;;  %v2989_v36 = vrot.slane %v2987_v25, 4  ;;  %v2996_v4 = vshll.u32 %v7174_v8, 16  ;;  %v5997_v51 = vld [vmem:[%s7670_s4 + $0x100] sm:$0xff]  }
 0x1de   : > { %v2969_v1 = vor.u32 %v2968_v10, %v2965_v32  ;;  %v2992_v3 = vrot.slane %v2990_v42, 5  ;;  %v7201_v55 = vsel %vm6651_vm6, %v4275_v49, %v4276_v34  ;;  %v3000_v7 = vshrl.u32 %v7174_v8, 16  ;;  %v4216_v32 = vld [vmem:[#allocation2 + $0x54] sm:$0xe]  ;;  %v2839_v42 = vld [vmem:[#allocation2 + $0x60] sm:$0xf] }
 0x1df   : > { %5657 = vmatpush3.bf16.msra.mxu0 %v7133_v41  ;;  %v7208_v10 = vrot.slane %v2996_v4, 5  ;;  %v4280_v25 = vrot.slane %v7189_v48, 5  ;;  %v7727_v34 = vcombine.low %v6861_v30, %v6841_v9  ;;  %v7218_v49 = vsel %vm6651_vm6, %v5090_v37, %v4273_v60  ;;  %v5998_v37 = vld [vmem:[%s7670_s4 + $0x108] sm:$0xff]  }
 0x1e0   : > { %5547 = vmatmul.mubr.msk.bf16.vlgmr.msra.gmra.mrb[0].mxu1 %vm441_vm0, %v7040_v21  ;;  %v2979_v21 = vor.u32 %v2978_v23, %v7186_v40  ;;  %v4958_v23 = vcombine.low %v2951_v57, %v2961_v38  ;;  %v3002_v41 = vrot.slane %v3000_v7, 4  ;;  %v7728_v4 = vcombine.low %v6965_v28, %v6979_v0  ;;  %v7235_v48 = vld [vmem:[#allocation2 + $0x68] sm:$0x1] }
 0x1e1   : > { %5550 = vmatprep.mubr.msk.bf16.mxu1 %vm441_vm0, %v4956_v29  ;;  %5563 = vmatpush3.bf16.msra.mxu1 %v7081_v46  ;;  %v2993_v29 = vor.u32 %v2992_v3, %v2989_v36  ;;  %v3006_v46 = vshll.u32 %v7182_v54, 16  ;;  %v7220_v36 = vld [vmem:[#allocation2 + $0x5c] sm:$0x1]  ;;  %v7222_v3 = vld [vmem:[#allocation2 + $0x64] sm:$0xf]  ;;  %v2970_v30 = vrot.slane %v2969_v1, 4 }
 0x1e2   : > { %5564 = vmatprep.subr.bf16.mxu1 %v5996_v6  ;;  %5475 = vmatmul.mubr.msk.bf16.gmra.mrb[32].mxu0 %vm441_vm0, %v7727_v34  ;;  %v2980_v35 = vrot.slane %v2979_v21, 4  ;;  %v2984_v57 = vrot.slane %v2982_v56, 5  ;;  %v4282_v38 = vrot.slane %v4280_v25, 4  ;;  %v3003_v60 = vor.u32 %v3002_v41, %v7208_v10 }
 0x1e3   : > { %5658 = vmatprep.mubr.msk.bf16.mxu0 %vm441_vm0, %v7728_v4  ;;  %v5091_v21 = vrot.slane %v4216_v32, 9  ;;  %v3011_v7 = vshrl.u32 %v2839_v42, 16  ;;  %v3014_v34 = vshll.u32 %v2839_v42, 16  ;;  %v2994_v28 = vrot.slane %v2993_v29, 4  ;;  %v3244_v42 = vld [vmem:[#allocation2 + $0xc] sm:$0xe] }
 0x1e4   : > { %v3008_v0 = vrot.slane %v3006_v46, 5  ;;  %v4283_v4 = vrot.slane %v7220_v36, 5  ;;  %v3020_v56 = vshll.u32 %v7222_v3, 16  ;;  %v3004_v1 = vrot.slane %v3003_v60, 4 }
 0x1e5   : > { %5565 = vmatpush3.bf16.msra.mxu1 %v5996_v6  ;;  %v2985_v6 = vsel %vm6715_vm3, %v2980_v35, %v2984_v57  ;;  %v3013_v9 = vrot.slane %v3011_v7, 4  ;;  %v3016_v14 = vrot.slane %v3014_v34, 5  ;;  %v2975_v41 = vsel %vm6715_vm3, %v2970_v30, %v7186_v40 }
 0x1e6   : > { %5566 = vmatprep.subr.bf16.mxu1 %v5997_v51  ;;  %v7247_v32 = vsel %vm6651_vm6, %v4282_v38, %v4283_v4  ;;  %v7249_v29 = vrot.slane %v3020_v56, 5  ;;  %v3024_v46 = vshrl.u32 %v7222_v3, 16  ;;  %v7255_v35 = vsel %vm6651_vm6, %v5091_v21, %v4280_v25  ;;  %v3245_v21 = vld [vmem:[#allocation2 + $0x18] sm:$0xe] }
 0x1e7   : > { %v3030_v57 = vshll.u32 %v7235_v48, 16  ;;  %v3278_v40 = vrot.slane %v6899_v11, 5  ;;  %v4959_v30 = vcombine.low %v2975_v41, %v2985_v6  ;;  %v2999_v38 = vsel %vm6715_vm3, %v2994_v28, %v7208_v10 }
 0x1e8   : > { %5551 = vmatmul.mubr.msk.bf16.gmra.mrb[4].mxu1 %vm441_vm0, %v7170_v17  ;;  %v3017_v17 = vor.u32 %v3016_v14, %v3013_v9  ;;  %v3009_v60 = vsel %vm6715_vm3, %v3004_v1, %v3008_v0  ;;  %v3026_v25 = vrot.slane %v3024_v46, 4  ;;  %v7729_v14 = vcombine.low %v7047_v44, %v7061_v19  ;;  %v3246_v19 = vld [vmem:[#allocation2 + $0x24] sm:$0xe] }
 0x1e9   : > { %5554 = vmatprep.mubr.msk.bf16.mxu1 %vm441_vm0, %v4958_v23  ;;  %5567 = vmatpush3.bf16.msra.mxu1 %v5997_v51  ;;  %v5999_v51 = vld [vmem:[%s7670_s4 + $0x110] sm:$0xff]   ;;  %v5111_v11 = vcombine.low %v7255_v35, %v7247_v32  ;;  %v4976_v23 = vrot.slane %v3244_v42, 9  ;;  %v3280_v9 = vrot.slane %v3278_v40, 4  ;;  %v3285_v10 = vrot.slane %v6927_v62, 5  ;;  %v6002_v35 = vld [vmem:[%s7670_s4 + $0x128] sm:$0xff]  }
 0x1ea   : > { %5568 = vmatprep.subr.bf16.mxu1 %v5998_v37  ;;  %5659 = vmatmul.mubr.msk.bf16.vlgmr.msra.gmra.mrb[36].mxu0 %vm441_vm0, %v7729_v14  ;;  %v7730_v7 = vcombine.low %v7065_v43, %v7110_v50  ;;  %v3018_v34 = vrot.slane %v3017_v17, 4  ;;  %v3027_v28 = vor.u32 %v3026_v25, %v7249_v29  ;;  %v3281_v44 = vrot.slane %v6907_v27, 5  ;;  %v6000_v50 = vld [vmem:[%s7670_s4 + $0x118] sm:$0xff]  }
 0x1eb   : > { %v3292_v0 = vrot.slane %v6956_v22, 5  ;;  %v4960_v4 = vcombine.low %v2999_v38, %v3009_v60  ;;  %v3032_v56 = vrot.slane %v3030_v57, 5  ;;  %v3287_v6 = vrot.slane %v3285_v10, 4  ;;  %v3248_v60 = vld [vmem:[#allocation2 + $0x3c] sm:$0xe] }
 0x1ec   : > { %5662 = vmatprep.mubr.msk.bf16.mxu0 %vm441_vm0, %v7730_v7  ;;  %v3288_v1 = vrot.slane %v6944_v20, 5  ;;  %v3028_v62 = vrot.slane %v3027_v28, 4  ;;  %v3282_v43 = vsel %vm6651_vm6, %v3280_v9, %v3281_v44  ;;  %v4977_v41 = vrot.slane %v3245_v21, 9  ;;  %v3247_v20 = vld [vmem:[#allocation2 + $0x30] sm:$0xe] }
 0x1ed   : > { %5569 = vmatpush3.bf16.msra.mxu1 %v5998_v37  ;;  %v3294_v27 = vrot.slane %v3292_v0, 4  ;;  %v3279_v22 = vsel %vm6651_vm6, %v4976_v23, %v3278_v40  ;;  %v4978_v46 = vrot.slane %v3246_v19, 9  ;;  %v3299_v42 = vrot.slane %v7038_v45, 5  ;;  %v3249_v21 = vld [vmem:[#allocation2 + $0x48] sm:$0xe] }
 0x1ee   : > { %5570 = vmatprep.subr.bf16.mxu1 %v5999_v51  ;;  %v7291_v37 = vsel %vm6651_vm6, %v3287_v6, %v3288_v1  ;;  %v3023_v17 = vsel %vm6715_vm3, %v3018_v34, %v7249_v29  ;;  %v3033_v57 = vsel %vm6715_vm3, %v3028_v62, %v3032_v56  ;;  %v7302_v40 = vsel %vm6651_vm6, %v4977_v41, %v3285_v10  ;;  %v3250_v44 = vld [vmem:[#allocation2 + $0x54] sm:$0xe]  ;;  %v3788_v41 = vld [vmem:[#allocation2 + $0x24] sm:$0xf] }
 0x1ef   : > { %v3295_v38 = vrot.slane %v6967_v58, 5  ;;  %v4996_v45 = vcombine.low %v3279_v22, %v3282_v43  ;;  %v3301_v25 = vrot.slane %v3299_v42, 4  ;;  %v3302_v29 = vrot.slane %v7067_v13, 5  ;;  %v7316_v58 = vld [vmem:[%s7670_s4 + $0x120] sm:$0xff]  }
 0x1f0   : > { %5555 = vmatmul.mubr.msk.bf16.gmra.mrb[8].mxu1 %vm441_vm0, %v4959_v30  ;;  %v7308_v30 = vsel %vm6651_vm6, %v4978_v46, %v3292_v0  ;;  %v4997_v14 = vcombine.low %v7302_v40, %v7291_v37  ;;  %v4979_v23 = vrot.slane %v3247_v20, 9  ;;  %v3306_v9 = vrot.slane %v7050_v16, 5  ;;  %v6003_v37 = vld [vmem:[%s7670_s4 + $0x130] sm:$0xff]  }
 0x1f1   : > { %5558 = vmatprep.mubr.msk.bf16.mxu1 %vm441_vm0, %v4960_v4  ;;  %5571 = vmatpush3.bf16.msra.mxu1 %v5999_v51  ;;  %v7320_v51 = vsel %vm6651_vm6, %v3294_v27, %v3295_v38  ;;  %v7731_v13 = vcombine.low %v7154_v63, %v7164_v5  ;;  %v4961_v10 = vcombine.low %v3023_v17, %v3033_v57  ;;  %v4980_v34 = vrot.slane %v3248_v60, 9  ;;  %v3785_v4 = vld [vmem:[#allocation2 + $0x18] sm:$0xf] }
 0x1f2   : > { %5572 = vmatprep.subr.bf16.mxu1 %v6000_v50  ;;  %v7329_v7 = vsel %vm6651_vm6, %v3301_v25, %v3302_v29  ;;  %v3313_v28 = vrot.slane %v7146_v31, 5  ;;  %v7732_v19 = vcombine.low %v7218_v49, %v7201_v55  ;;  %v7338_v16 = vsel %vm6651_vm6, %v4979_v23, %v3299_v42 }
 0x1f3   : > { %5663 = vmatmul.mubr.msk.bf16.gmra.mrb[40].mxu0 %vm441_vm0, %v7731_v13  ;;  %v3308_v63 = vrot.slane %v3306_v9, 4  ;;  %v3309_v5 = vrot.slane %v7094_v39, 5  ;;  %v3320_v0 = vrot.slane %v7174_v8, 5  ;;  %v4998_v31 = vcombine.low %v7308_v30, %v7320_v51 }
 0x1f4   : > { %5666 = vmatprep.mubr.msk.bf16.mxu0 %vm441_vm0, %v7732_v19  ;;  %v4981_v56 = vrot.slane %v3249_v21, 9  ;;  %v3315_v6 = vrot.slane %v3313_v28, 4  ;;  %v3316_v55 = vrot.slane %v7167_v15, 5  ;;  %v4999_v49 = vcombine.low %v7338_v16, %v7329_v7  ;;  %v3800_v16 = vld [vmem:[#allocation2 + $0x54] sm:$0xf] }
 0x1f5   : > { %5573 = vmatpush3.bf16.msra.mxu1 %v6000_v50  ;;  %v7350_v1 = vsel %vm6651_vm6, %v3308_v63, %v3309_v5  ;;  %v4982_v39 = vrot.slane %v3250_v44, 9  ;;  %v3322_v8 = vrot.slane %v3320_v0, 4  ;;  %v7354_v62 = vsel %vm6651_vm6, %v4980_v34, %v3306_v9  ;;  %v3791_v9 = vld [vmem:[#allocation2 + $0x30] sm:$0xf] }
 0x1f6   : > { %5590 = vmatprep.subr.bf16.mxu1 %v7316_v58  ;;  %v7358_v43 = vsel %vm6651_vm6, %v3315_v6, %v3316_v55  ;;  %v3327_v15 = vrot.slane %v7222_v3, 5  ;;  %v3810_v50 = vshrl.u32 %v3785_v4, 16  ;;  %v5000_v27 = vcombine.low %v7354_v62, %v7350_v1  ;;  %v6008_v3 = vld [vmem:[#allocation2 + $0x24] sm:$0xff]  }
 0x1f7   : > { %v7366_v22 = vsel %vm6651_vm6, %v4981_v56, %v3313_v28  ;;  %v7370_v46 = vsel %vm6651_vm6, %v4982_v39, %v3320_v0  ;;  %v3323_v20 = vrot.slane %v7182_v54, 5  ;;  %v3813_v57 = vshll.u32 %v3785_v4, 16 }
 0x1f8   : > { %5559 = vmatmul.mubr.msk.bf16.gmra.mrb[12].mxu1 %vm441_vm0, %v4961_v10  ;;  %v5001_v42 = vcombine.low %v7366_v22, %v7358_v43  ;;  %v3812_v17 = vrot.slane %v3810_v50, 4  ;;  %v3819_v38 = vshll.u32 %v6914_v12, 16  ;;  %v3823_v30 = vshrl.u32 %v6914_v12, 16  ;;  %v6009_v43 = vld [vmem:[%s7670_s4 + $0x150] sm:$0xff]  }
 0x1f9   : > { %5574 = vmatprep.mubr.msk.bf16.mxu1 %vm441_vm0, %v4996_v45  ;;  %v7379_v60 = vsel %vm6651_vm6, %v3322_v8, %v3323_v20  ;;  %v3829_v25 = vshll.u32 %v6942_v18, 16  ;;  %v3834_v29 = vshrl.u32 %v3788_v41, 16  ;;  %v7389_v54 = vrot.slane %v3327_v15, 4  ;;  %v3794_v20 = vld [vmem:[#allocation2 + $0x3c] sm:$0xf] }
 0x1fa   : > { %v3815_v45 = vrot.slane %v3813_v57, 5  ;;  %v3821_v51 = vrot.slane %v3819_v38, 5  ;;  %v3837_v23 = vshll.u32 %v3788_v41, 16  ;;  %v3825_v21 = vrot.slane %v3823_v30, 4 }
 0x1fb   : > { %5667 = vmatmul.mubr.msk.bf16.gmra.mrb[44].mxu0 %vm441_vm0, %v5111_v11  ;;  %v3831_v13 = vrot.slane %v3829_v25, 5  ;;  %v3836_v10 = vrot.slane %v3834_v29, 4  ;;  %v3843_v12 = vshll.u32 %v6990_v47, 16  ;;  %v3847_v28 = vshrl.u32 %v6990_v47, 16 }
 0x1fc   : > { %v3816_v18 = vor.u32 %v3815_v45, %v3812_v17  ;;  %v3839_v34 = vrot.slane %v3837_v23, 5  ;;  %v3853_v32 = vshll.u32 %v7023_v53, 16  ;;  %v3826_v11 = vor.u32 %v3825_v21, %v3821_v51  ;;  %v3797_v21 = vld [vmem:[#allocation2 + $0x48] sm:$0xf] }
 0x1fd   : > { %v3845_v44 = vrot.slane %v3843_v12, 5  ;;  %v3858_v19 = vshrl.u32 %v3791_v9, 16  ;;  %v3861_v63 = vshll.u32 %v3791_v9, 16  ;;  %v3849_v4 = vrot.slane %v3847_v28, 4 }
 0x1fe   : > { %v3817_v5 = vrot.slane %v3816_v18, 4  ;;  %v3840_v0 = vor.u32 %v3839_v34, %v3836_v10  ;;  %v3855_v56 = vrot.slane %v3853_v32, 5  ;;  %v3827_v47 = vrot.slane %v3826_v11, 4 }
 0x1ff   : > { %v3860_v6 = vrot.slane %v3858_v19, 4  ;;  %v3863_v53 = vrot.slane %v3861_v63, 5  ;;  %v3867_v55 = vshll.u32 %v6996_v33, 16  ;;  %v3850_v50 = vor.u32 %v3849_v4, %v3845_v44 }
 0x200   : > { %5575 = vmatmul.mubr.msk.bf16.vlgmr.msra.gmra.mrb[0].mxu1 %vm441_vm0, %v4997_v14  ;;  %v3822_v39 = vsel %vm6715_vm3, %v3817_v5, %v3821_v51  ;;  %v3841_v8 = vrot.slane %v3840_v0, 4  ;;  %v3871_v41 = vshrl.u32 %v6996_v33, 16  ;;  %v3832_v40 = vsel %vm6715_vm3, %v3827_v47, %v3831_v13  ;;  %v6004_v13 = vld [vmem:[%s7670_s4 + $0x138] sm:$0xff]  }
 0x201   : > { %5578 = vmatprep.mubr.msk.bf16.mxu1 %vm441_vm0, %v4998_v31  ;;  %5591 = vmatpush3.bf16.msra.mxu1 %v7316_v58  ;;  %v3864_v14 = vor.u32 %v3863_v53, %v3860_v6  ;;  %v3869_v31 = vrot.slane %v3867_v55, 5  ;;  %v3877_v58 = vshll.u32 %v7031_v59, 16  ;;  %v7413_v17 = vcombine.low %v3822_v39, %v3832_v40  ;;  %v7733_v53 = vld [vmem:[#allocation8_spill] sm:$0xff]  ;;  %v7734_v40 = vld [vmem:[#allocation9_spill] sm:$0xff] }
 0x202   : > { %5592 = vmatprep.subr.bf16.mxu1 %v6002_v35  ;;  %v3846_v57 = vsel %vm6715_vm3, %v3841_v8, %v3845_v44  ;;  %v3851_v38 = vrot.slane %v3850_v50, 4  ;;  %v3873_v33 = vrot.slane %v3871_v41, 4  ;;  %v3882_v29 = vshrl.u32 %v3794_v20, 16 }
 0x203   : > { %v3865_v30 = vrot.slane %v3864_v14, 4  ;;  %v3879_v25 = vrot.slane %v3877_v58, 5  ;;  %v3885_v45 = vshll.u32 %v3794_v20, 16  ;;  %v3891_v9 = vshll.u32 %v7086_v26, 16 }
 0x204   : > { %v3856_v51 = vsel %vm6715_vm3, %v3851_v38, %v3855_v56  ;;  %v3874_v23 = vor.u32 %v3873_v33, %v3869_v31  ;;  %v3895_v59 = vshrl.u32 %v7086_v26, 16  ;;  %v3884_v18 = vrot.slane %v3882_v29, 4  ;;  %v3251_v29 = vld [vmem:[#allocation2 + $0x60] sm:$0xe] }
 0x205   : > { %5593 = vmatpush3.bf16.msra.mxu1 %v6002_v35  ;;  %v7424_v10 = vcombine.low %v3846_v57, %v3856_v51  ;;  %v3870_v12 = vsel %vm6715_vm3, %v3865_v30, %v3869_v31  ;;  %v3887_v34 = vrot.slane %v3885_v45, 5  ;;  %v3893_v32 = vrot.slane %v3891_v9, 5  ;;  %v6007_v31 = vld [vmem:[%s7670_s4 + $0x148] sm:$0xff]  }
 0x206   : > { %5594 = vmatprep.subr.bf16.mxu1 %v6003_v37  ;;  %v3875_v28 = vrot.slane %v3874_v23, 4  ;;  %v3897_v35 = vrot.slane %v3895_v59, 4  ;;  %v3901_v11 = vshll.u32 %v7120_v61, 16  ;;  %v3906_v44 = vshrl.u32 %v3797_v21, 16 }
 0x207   : > { %v3888_v26 = vor.u32 %v3887_v34, %v3884_v18  ;;  %v3909_v19 = vshll.u32 %v3797_v21, 16  ;;  %v3915_v63 = vshll.u32 %v7114_v2, 16  ;;  %v3919_v7 = vshrl.u32 %v7114_v2, 16 }
 0x208   : > { %5579 = vmatmul.mubr.msk.bf16.gmra.mrb[4].mxu1 %vm441_vm0, %v4999_v49  ;;  %v3880_v5 = vsel %vm6715_vm3, %v3875_v28, %v3879_v25  ;;  %v3898_v61 = vor.u32 %v3897_v35, %v3893_v32  ;;  %v3903_v0 = vrot.slane %v3901_v11, 5  ;;  %v6005_v49 = vld [vmem:[%s7670_s4 + $0x140] sm:$0xff]   ;;  %v3908_v1 = vrot.slane %v3906_v44, 4 }
 0x209   : > { %5582 = vmatprep.mubr.msk.bf16.mxu1 %vm441_vm0, %v5000_v27  ;;  %5595 = vmatpush3.bf16.msra.mxu1 %v6003_v37  ;;  %v7444_v4 = vcombine.low %v3870_v12, %v3880_v5  ;;  %v3889_v56 = vrot.slane %v3888_v26, 4  ;;  %v3911_v62 = vrot.slane %v3909_v19, 5  ;;  %v3917_v47 = vrot.slane %v3915_v63, 5  ;;  %v6010_v26 = vld [vmem:[#allocation2 + $0x30] sm:$0xff]   ;;  %v6014_v44 = vld [vmem:[%s7670_s4 + $0x160] sm:$0xff]   ;;  %v6016_v63 = vld [vmem:[%s7670_s4 + $0x168] sm:$0xff]  }
 0x20a   : > { %5596 = vmatprep.subr.bf16.mxu1 %v6004_v13  ;;  %v3899_v27 = vrot.slane %v3898_v61, 4  ;;  %v3921_v6 = vrot.slane %v3919_v7, 4  ;;  %v3925_v55 = vshll.u32 %v7733_v53, 16  ;;  %v5002_v39 = vcombine.low %v7370_v46, %v7379_v60  ;;  %v6012_v19 = vld [vmem:[#allocation2 + $0x3c] sm:$0xff]   ;;  %v6013_v5 = vld [vmem:[#allocation2 + $0x48] sm:$0xff]   ;;  %v6018_v61 = vld [vmem:[%s7670_s4 + $0x170] sm:$0xff]  }
 0x20b   : > { %v3912_v2 = vor.u32 %v3911_v62, %v3908_v1  ;;  %v3930_v8 = vshrl.u32 %v3800_v16, 16  ;;  %v3933_v50 = vshll.u32 %v3800_v16, 16  ;;  %v3894_v41 = vsel %vm6715_vm3, %v3889_v56, %v3893_v32  ;;  %v6006_v32 = vld [vmem:[#allocation2 + $0x18] sm:$0xff]   ;;  %v6017_v16 = vld [vmem:[#allocation2 + $0x60] sm:$0xff]  }
 0x20c   : > { %v3904_v20 = vsel %vm6715_vm3, %v3899_v27, %v3903_v0  ;;  %v3922_v37 = vor.u32 %v3921_v6, %v3917_v47  ;;  %v3939_v14 = vshll.u32 %v7734_v40, 16  ;;  %v3927_v33 = vrot.slane %v3925_v55, 5  ;;  %v6015_v0 = vld [vmem:[#allocation2 + $0x54] sm:$0xff]   ;;  %v6021_v56 = vld [vmem:[%s7670_s4 + $0x180] sm:$0xff]  }
 0x20d   : > { %5597 = vmatpush3.bf16.msra.mxu1 %v6004_v13  ;;  %v7457_v58 = vcombine.low %v3894_v41, %v3904_v20  ;;  %v3913_v46 = vrot.slane %v3912_v2, 4  ;;  %v3932_v60 = vrot.slane %v3930_v8, 4  ;;  %v3935_v57 = vrot.slane %v3933_v50, 5  ;;  %v6020_v7 = vld [vmem:[%s7670_s4 + $0x178] sm:$0xff]   ;;  %v7518_v1 = vld [vmem:[#allocation2 + $0x64] sm:$0xf] }
 0x20e   : > { %5598 = vmatprep.subr.bf16.mxu1 %v6005_v49  ;;  %v3923_v38 = vrot.slane %v3922_v37, 4  ;;  %v3941_v30 = vrot.slane %v3939_v14, 5  ;;  %v3943_v25 = vshrl.u32 %v7734_v40, 16  ;;  %v3330_v45 = vrot.slane %v7235_v48, 5  ;;  %v3803_v62 = vld [vmem:[#allocation2 + $0x60] sm:$0xf] }
 0x20f   : > { %v3936_v51 = vor.u32 %v3935_v57, %v3932_v60  ;;  %v3918_v23 = vsel %vm6715_vm3, %v3913_v46, %v3917_v47  ;;  %v3949_v21 = vshll.u32 %v7220_v36, 16  ;;  %v4983_v48 = vrot.slane %v3251_v29, 9  ;;  %v7524_v2 = vld [vmem:[#allocation2 + $0x70] sm:$0xf]  ;;  %v3806_v41 = vld [vmem:[#allocation2 + $0x6c] sm:$0xf] }
 0x210   : > { %5583 = vmatmul.mubr.msk.bf16.gmra.mrb[8].mxu1 %vm441_vm0, %v5001_v42  ;;  %v3928_v9 = vsel %vm6715_vm3, %v3923_v38, %v3927_v33  ;;  %v3945_v59 = vrot.slane %v3943_v25, 4  ;;  %v3331_v42 = vsel %vm6651_vm6, %v7389_v54, %v3330_v45  ;;  %v3963_v27 = vshll.u32 %v7518_v1, 16  ;;  %v3805_v20 = vld [vmem:[#allocation2 + $0x68] sm:$0x1]  ;;  %v7736_v46 = vld [vmem:[#allocation4_spill] sm:$0xff] }
 0x211   : > { %5586 = vmatprep.mubr.msk.bf16.mxu1 %vm441_vm0, %v5002_v39  ;;  %5599 = vmatpush3.bf16.msra.mxu1 %v6005_v49  ;;  %v7474_v22 = vcombine.low %v3918_v23, %v3928_v9  ;;  %v3937_v13 = vrot.slane %v3936_v51, 4  ;;  %v3328_v18 = vsel %vm6651_vm6, %v4983_v48, %v3327_v15  ;;  %v3951_v34 = vrot.slane %v3949_v21, 5  ;;  %v6011_v15 = vld [vmem:[%s7670_s4 + $0x158] sm:$0xff]   ;;  %v6019_v49 = vld [vmem:[#allocation2 + $0x6c] sm:$0xff]   ;;  %v3808_v23 = vld [vmem:[#allocation2 + $0x74] sm:$0x1] }
 0x212   : > { %5600 = vmatprep.subr.bf16.mxu1 %v6007_v31  ;;  %v3946_v12 = vor.u32 %v3945_v59, %v3941_v30  ;;  %v5003_v28 = vcombine.low %v3328_v18, %v3331_v42  ;;  %v3967_v47 = vshrl.u32 %v7518_v1, 16  ;;  %v3954_v6 = vshrl.u32 %v3803_v62, 16  ;;  %v7737_v51 = vld [vmem:[#allocation5_spill] sm:$0xff]  ;;  %v7738_v48 = vld [vmem:[#allocation6_spill] sm:$0xff] }
 0x213   : > { %v3942_v35 = vsel %vm6715_vm3, %v3937_v13, %v3941_v30  ;;  %v3957_v53 = vshll.u32 %v3803_v62, 16  ;;  %v3965_v55 = vrot.slane %v3963_v27, 5  ;;  %v3987_v37 = vshll.u32 %v7524_v2, 16 }
 0x214   : > { %v3947_v36 = vrot.slane %v3946_v12, 4  ;;  %v3969_v39 = vrot.slane %v3967_v47, 4  ;;  %v3956_v8 = vrot.slane %v3954_v6, 4  ;;  %v3991_v40 = vshrl.u32 %v7524_v2, 16 }
 0x215   : > { %5601 = vmatpush3.bf16.msra.mxu1 %v6007_v31  ;;  %v3959_v50 = vrot.slane %v3957_v53, 5  ;;  %v3981_v31 = vshll.u32 %v3806_v41, 16  ;;  %v3989_v57 = vrot.slane %v3987_v37, 5  ;;  %v4287_v21 = vrot.slane %v7518_v1, 5 }
 0x216   : > { %5618 = vmatprep.subr.bf16.mxu1 %v6009_v43  ;;  %v3952_v11 = vsel %vm6715_vm3, %v3947_v36, %v3951_v34  ;;  %v3970_v14 = vor.u32 %v3969_v39, %v3965_v55  ;;  %v3993_v38 = vrot.slane %v3991_v40, 4  ;;  %v4217_v34 = vld [vmem:[#allocation2 + $0x60] sm:$0xe] }
 0x217   : > { %v7488_v54 = vcombine.low %v3942_v35, %v3952_v11  ;;  %v3960_v60 = vor.u32 %v3959_v50, %v3956_v8  ;;  %v3983_v25 = vrot.slane %v3981_v31, 5  ;;  %v4289_v12 = vrot.slane %v4287_v21, 4 }
 0x218   : > { %5587 = vmatmul.mubr.msk.bf16.gmra.mrb[12].mxu1 %vm441_vm0, %v5003_v28  ;;  %v3971_v33 = vrot.slane %v3970_v14, 4  ;;  %v3994_v9 = vor.u32 %v3993_v38, %v3989_v57  ;;  %v4290_v28 = vrot.slane %v3805_v20, 5  ;;  %v5092_v11 = vrot.slane %v4217_v34, 9 }
 0x219   : > { %5602 = vmatprep.mubr.msk.bf16.mxu1 %vm441_vm0, %v6006_v32  ;;  %v3961_v29 = vrot.slane %v3960_v60, 4  ;;  %v7739_v32 = vld [vmem:[#allocation7_spill] sm:$0xff] }
 0x21a   : > { %v3995_v13 = vrot.slane %v3994_v9, 4 }
 0x220   : > { %5603 = vmatmul.mubr.msk.bf16.vlgmr.msra.gmra.mrb[0].mxu1 %vm441_vm0, %v6008_v3  ;;  %v4291_v3 = vsel %vm6651_vm6, %v4289_v12, %v4290_v28 }
 0x221   : > { %5606 = vmatprep.mubr.msk.bf16.mxu1 %vm441_vm0, %v6010_v26  ;;  %5619 = vmatpush3.bf16.msra.mxu1 %v6009_v43  ;;  %v3997_v43 = vshll.u32 %v3808_v23, 16  ;;  %v4288_v26 = vsel %vm6651_vm6, %v5092_v11, %v4287_v21 }
 0x222   : > { %5620 = vmatprep.subr.bf16.mxu1 %v6011_v15 }
 0x223   : > { %v3999_v36 = vrot.slane %v3997_v43, 5 }
 0x225   : > { %5621 = vmatpush3.bf16.msra.mxu1 %v6011_v15  ;;  %v4000_v35 = vsel %vm6715_vm3, %v3995_v13, %v3999_v36 }
 0x226   : > { %5622 = vmatprep.subr.bf16.mxu1 %v6014_v44 }
 0x228   : > { %5607 = vmatmul.mubr.msk.bf16.gmra.mrb[4].mxu1 %vm441_vm0, %v6012_v19  ;;  %v5112_v19 = vcombine.low %v4288_v26, %v4291_v3 }
 0x229   : > { %5610 = vmatprep.mubr.msk.bf16.mxu1 %vm441_vm0, %v6013_v5  ;;  %5623 = vmatpush3.bf16.msra.mxu1 %v6014_v44  ;;  %v4294_v44 = vrot.slane %v7524_v2, 5  ;;  %v4218_v5 = vld [vmem:[#allocation2 + $0x6c] sm:$0xe] }
 0x22a   : > { %5624 = vmatprep.subr.bf16.mxu1 %v6016_v63 }
 0x22d   : > { %5625 = vmatpush3.bf16.msra.mxu1 %v6016_v63  ;;  %v4296_v63 = vrot.slane %v4294_v44, 4 }
 0x22e   : > { %5626 = vmatprep.subr.bf16.mxu1 %v6018_v61 }
 0x230   : > { %5611 = vmatmul.mubr.msk.bf16.gmra.mrb[8].mxu1 %vm441_vm0, %v6015_v0  ;;  %v5093_v0 = vrot.slane %v4218_v5, 9 }
 0x231   : > { %5614 = vmatprep.mubr.msk.bf16.mxu1 %vm441_vm0, %v6017_v16  ;;  %5627 = vmatpush3.bf16.msra.mxu1 %v6018_v61  ;;  %v4297_v61 = vrot.slane %v3808_v23, 5 }
 0x232   : > { %5628 = vmatprep.subr.bf16.mxu1 %v6020_v7 }
 0x233   : > { %v4298_v24 = vsel %vm6651_vm6, %v4296_v63, %v4297_v61 }
 0x235   : > { %5629 = vmatpush3.bf16.msra.mxu1 %v6020_v7  ;;  %v4295_v7 = vsel %vm6651_vm6, %v5093_v0, %v4294_v44 }
 0x236   : > { %5674 = vmatprep.subr.bf16.mxu1 %v6021_v56  ;;  %v5113_v16 = vcombine.low %v4295_v7, %v4298_v24 }
 0x238   : > { %5615 = vmatmul.mubr.msk.bf16.gmra.mrb[12].mxu1 %vm441_vm0, %v6019_v49 }
 0x239   : > { %5630 = vmatprep.mubr.msk.bf16.mxu1 %vm441_vm0, %v7413_v17  ;;  %v7735_v17 = vld [vmem:[#allocation3_spill] sm:$0xff] }
 0x240   : > { %5631 = vmatmul.mubr.msk.bf16.vlgmr.msra.gmra.mrb[0].mxu1 %vm441_vm0, %v7424_v10  ;;  %v3978_v10 = vshrl.u32 %v3806_v41, 16 }
 0x241   : > { %5634 = vmatprep.mubr.msk.bf16.mxu1 %vm441_vm0, %v7444_v4  ;;  %5680 = vmatpush3.bf16.msra.mxu1 %v6021_v56  ;;  %v3973_v4 = vshll.u32 %v3805_v20, 16 }
 0x242   : > { %5675 = vmatprep.subr.bf16.mxu1 %v7735_v17  ;;  %v3980_v30 = vrot.slane %v3978_v10, 4 }
 0x243   : > { %v3975_v45 = vrot.slane %v3973_v4, 5 }
 0x245   : > { %5681 = vmatpush3.bf16.msra.mxu1 %v7735_v17  ;;  %v3976_v59 = vsel %vm6715_vm3, %v3971_v33, %v3975_v45  ;;  %v7588_v45 = vld [vmem:[%s7671_s5] ss:$0 sm:$0xff] }
 0x246   : > { %5676 = vmatprep.subr.bf16.mxu1 %v7736_v46 }
 0x248   : > { %5635 = vmatmul.mubr.msk.bf16.gmra.mrb[4].mxu1 %vm441_vm0, %v7457_v58  ;;  %v3984_v58 = vor.u32 %v3983_v25, %v3980_v30 }
 0x249   : > { %5638 = vmatprep.mubr.msk.bf16.mxu1 %vm441_vm0, %v7474_v22  ;;  %5682 = vmatpush3.bf16.msra.mxu1 %v7736_v46  ;;  %v3966_v22 = vsel %vm6715_vm3, %v3961_v29, %v3965_v55 }
 0x24a   : > { %5677 = vmatprep.subr.bf16.mxu1 %v7737_v51  ;;  %v5070_v42 = vcombine.low %v3966_v22, %v3976_v59  ;;  %v3985_v18 = vrot.slane %v3984_v58, 4 }
 0x24d   : > { %5683 = vmatpush3.bf16.msra.mxu1 %v7737_v51 }
 0x24e   : > { %5678 = vmatprep.subr.bf16.mxu1 %v7738_v48 }
 0x250   : > { %5639 = vmatmul.mubr.msk.bf16.gmra.mrb[8].mxu1 %vm441_vm0, %v7488_v54  ;;  %v3990_v54 = vsel %vm6715_vm3, %v3985_v18, %v3989_v57 }
 0x251   : > { %5642 = vmatprep.mubr.msk.bf16.mxu1 %vm441_vm0, %v5070_v42  ;;  %5684 = vmatpush3.bf16.msra.mxu1 %v7738_v48  ;;  %v5071_v15 = vcombine.low %v3990_v54, %v4000_v35 }
 0x252   : > { %5679 = vmatprep.subr.bf16.mxu1 %v7739_v32 }
 0x255   : > { %5685 = vmatpush3.bf16.msra.mxu1 %v7739_v32 }
 0x258   : > { %5643 = vmatmul.mubr.msk.bf16.gmra.mrb[12].mxu1 %vm441_vm0, %v5071_v15 }
 0x259   : > { %5670 = vmatprep.mubr.msk.bf16.mxu1 %vm441_vm0, %v5112_v19 }
 0x264   : > { %5671 = vmatmul.mubr.msk.bf16.vlgmr.msra.gmra.mrb[12].mxu1 %vm441_vm0, %v5113_v16  ;;  %vm4532_vm0 = vcmask 56320  }
 0x29d   : > { %v5464_v49 = vpop.f32.mrb[20].mxu0 }
 0x29e   : > { %v2219_v56 = vpop.f32.mrb[21].mxu0 }
 0x29f   : > { %v5465_v1 = vpop.f32.mrb[22].mxu0 }
 0x2a0   : > { %v2222_v62 = vpop.f32.mrb[23].mxu0 }
 0x2a5   : > { %v5468_v27 = vpop.f32.mrb[24].mxu0 }
 0x2a6   : > { %v2235_v47 = vpop.f32.mrb[25].mxu0 }
 0x2a7   : > { %v5469_v6 = vpop.f32.mrb[26].mxu0 }
 0x2a8   : > { %v2238_v53 = vpop.f32.mrb[27].mxu0 }
 0x2ad   : > { %v7568_v55 = vpop.f32.mrb[28].mxu0 }
 0x2ae   : > { %v7570_v39 = vpop.f32.mrb[29].mxu0 }
 0x2af   : > { %v7572_v2 = vpop.f32.mrb[30].mxu0 }
 0x2b0   : > { %v7574_v17 = vpop.f32.mrb[31].mxu0 }
 0x2b5   : > { %v7576_v52 = vpop.f32.mrb[32].mxu0 }
 0x2b6   : > { %v7578_v8 = vpop.f32.mrb[33].mxu0 }
 0x2b7   : > { %v7580_v50 = vpop.f32.mrb[34].mxu0 }
 0x2b8   : > { %v7582_v41 = vpop.f32.mrb[35].mxu0 }
 0x2bd   : > { %v5660_v20 = vpop.f32.mrb[36].mxu0 }
 0x2be   : > { %v4430_v37 = vpop.f32.mrb[37].mxu0 }
 0x2bf   : > { %v5661_v40 = vpop.f32.mrb[38].mxu0 }
 0x2c0   : > { %v4433_v14 = vpop.f32.mrb[39].mxu0 }
 0x2c6   : > { %v5664_v10 = vpop.f32.mrb[40].mxu0 }
 0x2c7   : > { %v4446_v31 = vpop.f32.mrb[41].mxu0 }
 0x2c8   : > { %v5665_v46 = vpop.f32.mrb[42].mxu0 }
 0x2c9   : > { %v4449_v60 = vpop.f32.mrb[43].mxu0 }
 0x2ce   : > { %v5668_v4 = vpop.f32.mrb[44].mxu0 }
 0x2cf   : > { %v4462_v57 = vpop.f32.mrb[45].mxu0 }
 0x2d0   : > { %v5669_v38 = vpop.f32.mrb[46].mxu0 }
 0x2d1   : > { %v4465_v33 = vpop.f32.mrb[47].mxu0 }
 0x313   : > { %v5632_v30 = vpop.f32.mrb[0].mxu1 }
 0x314   : > { %v5686_v25 = vadd.f32 %v5632_v30, %v5464_v49  ;;  %v4132_v29 = vpop.f32.mrb[1].mxu1 }
 0x315   : > { %v5688_v51 = vadd.f32 %v4132_v29, %v2219_v56  ;;  %v5633_v23 = vpop.f32.mrb[2].mxu1 }
 0x316   : > { %v5687_v9 = vadd.f32 %v5686_v25, %v5660_v20  ;;  %v5690_v59 = vadd.f32 %v5633_v23, %v5465_v1  ;;  %v4135_v21 = vpop.f32.mrb[3].mxu1 }
 0x317   : > { %v5689_v58 = vadd.f32 %v5688_v51, %v4430_v37  ;;  %v5692_v43 = vadd.f32 %v4135_v21, %v2222_v62 }
 0x318   : > { %v4518_v22 = vadd.f32 %v5687_v9, %v7588_v45  ;;  %v5691_v48 = vadd.f32 %v5690_v59, %v5661_v40 }
 0x319   : > { %v4516_v42 = vadd.f32 %v5689_v58, %v7588_v45  ;;  %v5693_v13 = vadd.f32 %v5692_v43, %v4433_v14 }
 0x31a   : > { %4535 = vst.msk [vmem:[%s7593_s8 + $0x10] sm:$0xff] %vm4532_vm0, %v4518_v22  ;;  %v4519_v12 = vadd.f32 %v5691_v48, %v7588_v45 }
 0x31b   : > { %4533 = vst.msk [vmem:[%s7593_s8] sm:$0xff] %vm4532_vm0, %v4516_v42  ;;  %v4517_v18 = vadd.f32 %v5693_v13, %v7588_v45  ;;  %v5636_v36 = vpop.f32.mrb[4].mxu1 }
 0x31c   : > { %4536 = vst.msk [vmem:[%s7593_s8 + $0x18] sm:$0xff] %vm4532_vm0, %v4519_v12  ;;  %v5694_v34 = vadd.f32 %v5636_v36, %v5468_v27  ;;  %v4148_v28 = vpop.f32.mrb[5].mxu1 }
 0x31d   : > { %4534 = vst.msk [vmem:[%s7593_s8 + $0x8] sm:$0xff] %vm4532_vm0, %v4517_v18  ;;  %v5696_v32 = vadd.f32 %v4148_v28, %v2235_v47  ;;  %v5637_v35 = vpop.f32.mrb[6].mxu1 }
 0x31e   : > { %v5695_v11 = vadd.f32 %v5694_v34, %v5664_v10  ;;  %v5698_v3 = vadd.f32 %v5637_v35, %v5469_v6  ;;  %v4151_v54 = vpop.f32.mrb[7].mxu1 }
 0x31f   : > { %v5697_v15 = vadd.f32 %v5696_v32, %v4446_v31  ;;  %v5700_v26 = vadd.f32 %v4151_v54, %v2238_v53 }
 0x320   : > { %v4522_v44 = vadd.f32 %v5695_v11, %v7588_v45  ;;  %v5699_v19 = vadd.f32 %v5698_v3, %v5665_v46 }
 0x321   : > { %v4520_v63 = vadd.f32 %v5697_v15, %v7588_v45  ;;  %v5701_v5 = vadd.f32 %v5700_v26, %v4449_v60 }
 0x322   : > { %4539 = vst.msk [vmem:[%s7593_s8 + $0x30] sm:$0xff] %vm4532_vm0, %v4522_v44  ;;  %v4523_v61 = vadd.f32 %v5699_v19, %v7588_v45 }
 0x323   : > { %4537 = vst.msk [vmem:[%s7593_s8 + $0x20] sm:$0xff] %vm4532_vm0, %v4520_v63  ;;  %v4521_v0 = vadd.f32 %v5701_v5, %v7588_v45  ;;  %v5640_v24 = vpop.f32.mrb[8].mxu1 }
 0x324   : > { %4540 = vst.msk [vmem:[%s7593_s8 + $0x38] sm:$0xff] %vm4532_vm0, %v4523_v61  ;;  %v5702_v7 = vadd.f32 %v5640_v24, %v7568_v55  ;;  %v4164_v16 = vpop.f32.mrb[9].mxu1 }
 0x325   : > { %4538 = vst.msk [vmem:[%s7593_s8 + $0x28] sm:$0xff] %vm4532_vm0, %v4521_v0  ;;  %v5704_v49 = vadd.f32 %v4164_v16, %v7570_v39  ;;  %v5641_v56 = vpop.f32.mrb[10].mxu1 }
 0x326   : > { %v5703_v1 = vadd.f32 %v5702_v7, %v5668_v4  ;;  %v5706_v62 = vadd.f32 %v5641_v56, %v7572_v2  ;;  %v4167_v27 = vpop.f32.mrb[11].mxu1 }
 0x327   : > { %v5705_v47 = vadd.f32 %v5704_v49, %v4462_v57  ;;  %v5708_v6 = vadd.f32 %v4167_v27, %v7574_v17 }
 0x328   : > { %v4526_v53 = vadd.f32 %v5703_v1, %v7588_v45  ;;  %v5707_v20 = vadd.f32 %v5706_v62, %v5669_v38 }
 0x329   : > { %v4524_v55 = vadd.f32 %v5705_v47, %v7588_v45  ;;  %v5709_v37 = vadd.f32 %v5708_v6, %v4465_v33 }
 0x32a   : > { %4543 = vst.msk [vmem:[%s7593_s8 + $0x50] sm:$0xff] %vm4532_vm0, %v4526_v53  ;;  %v4527_v39 = vadd.f32 %v5707_v20, %v7588_v45 }
 0x32b   : > { %4541 = vst.msk [vmem:[%s7593_s8 + $0x40] sm:$0xff] %vm4532_vm0, %v4524_v55  ;;  %v4525_v2 = vadd.f32 %v5709_v37, %v7588_v45 }
 0x32c   : > { %4544 = vst.msk [vmem:[%s7593_s8 + $0x58] sm:$0xff] %vm4532_vm0, %v4527_v39 }
 0x32d   : > { %4542 = vst.msk [vmem:[%s7593_s8 + $0x48] sm:$0xff] %vm4532_vm0, %v4525_v2 }
 0x337   : > { %v5672_v17 = vpop.f32.mrb[12].mxu1 }
 0x338   : > { %v5710_v40 = vadd.f32 %v5672_v17, %v7576_v52  ;;  %v4478_v14 = vpop.f32.mrb[13].mxu1 }
 0x339   : > { %v5711_v10 = vadd.f32 %v4478_v14, %v7578_v8  ;;  %v5673_v31 = vpop.f32.mrb[14].mxu1 }
 0x33a   : > { %v4530_v46 = vadd.f32 %v5710_v40, %v7588_v45  ;;  %v5712_v60 = vadd.f32 %v5673_v31, %v7580_v50  ;;  %v4481_v4 = vpop.f32.mrb[15].mxu1 }
 0x33b   : > { %v4528_v57 = vadd.f32 %v5711_v10, %v7588_v45  ;;  %v5713_v38 = vadd.f32 %v4481_v4, %v7582_v41 }
 0x33c   : > { %4547 = vst.msk [vmem:[%s7593_s8 + $0x70] sm:$0xff] %vm4532_vm0, %v4530_v46  ;;  %v4531_v33 = vadd.f32 %v5712_v60, %v7588_v45 }
 0x33d   : > { %4545 = vst.msk [vmem:[%s7593_s8 + $0x60] sm:$0xff] %vm4532_vm0, %v4528_v57  ;;  %v4529_v52 = vadd.f32 %v5713_v38, %v7588_v45 }
 0x33e   : > { %4548 = vst.msk [vmem:[%s7593_s8 + $0x78] sm:$0xff] %vm4532_vm0, %v4531_v33 }
 0x33f   : > { %4546 = vst.msk [vmem:[%s7593_s8 + $0x68] sm:$0xff] %vm4532_vm0, %v4529_v52 }
 0x340 PF: > { %s16_s25 = sadd.s32 1, %s6060_s25   ;;  %s7740_s21 = smov %s6052_s23 }
 0x341   : > { %p13_p6 = scmp.ge.s32.totalorder %s16_s25, 6   ;;  %s7741_s22 = smov %s6056_s24 }
 0x342   : > { %s7742_s23 = smov %s7745_s26  ;;  %s7743_s24 = smov %s7749_s27 }
 0x343   :  { %15 = sbr.rel (!%p13_p6) target bundleno = 3 (0x3), region = 88 }

</bundles_post_ra>
